<compile_context>
chip_gen: v5e
topology: v5e:2x2
jax: 0.10.0
libtpu: 0.0.40
codegen_flags: <defaults>
</compile_context>

<pallas_src>
import functools
import math

import jax
import jax.numpy as jnp
from jax.experimental import pallas as pl
from jax.experimental.pallas import tpu as pltpu


def _layernorm(v, g, b, eps=1e-6):
    # eps=1e-6 matches nn.LayerNorm(dim, eps=1e-06) in the reference module.
    mu = jnp.mean(v, axis=-1, keepdims=True)
    var = jnp.mean((v - mu) ** 2, axis=-1, keepdims=True)
    return (v - mu) * jax.lax.rsqrt(var + eps) * g + b


def _erf(x):
    # Abramowitz & Stegun 7.1.26 rational approximation (|error| <= 1.5e-7).
    # Keeps exact-GELU semantics to f32 precision while only using ops that are
    # guaranteed to lower inside a Mosaic kernel (exp, abs, FMA, select).
    a1, a2, a3, a4, a5 = (0.254829592, -0.284496736, 1.421413741,
                          -1.453152027, 1.061405429)
    p = 0.3275911
    s = jnp.where(x >= 0.0, 1.0, -1.0)
    ax = jnp.abs(x)
    t = 1.0 / (1.0 + p * ax)
    poly = ((((a5 * t + a4) * t + a3) * t + a2) * t + a1) * t
    return s * (1.0 - poly * jnp.exp(-ax * ax))


def fused_model_kernel(x_ref, madd_ref, bands_ref,
                       ln1_g_ref, ln1_b_ref, wqkv_ref, bqkv_ref,
                       wrel_ref, brel_ref,
                       ln2_g_ref, ln2_b_ref, w1_ref, b1_ref, w2_ref, b2_ref,
                       ng_ref, nb_ref, wh_ref, bh_ref,
                       out_ref,
                       x_scratch,
                       *, heads, dh, rel_window, inv_scalar_norm):
    l = pl.program_id(0)              # layer (outer, "arbitrary")
    b = pl.program_id(1)              # batch element (inner, "parallel")
    num_layers = pl.num_programs(0)

    # Load this batch element's embeddings into the resident VMEM scratch once;
    # subsequent layer iterations update the scratch slice in place.
    @pl.when(l == 0)
    def _():
        x_scratch[b] = x_ref[0]

    x = x_scratch[b]                  # (S, D) f32
    S, D = x.shape
    r_used = 2 * rel_window + 1       # PyTorch's gather only reads buckets 0..2W
    madd = madd_ref[0]                # (1, S) additive key mask (0 / -1e30)

    # ---------------- relative self-attention sub-block (pre-LN, residual) ---
    h1 = _layernorm(x, ln1_g_ref[0], ln1_b_ref[0])
    qkv = jnp.dot(h1.astype(jnp.bfloat16), wqkv_ref[0],
                  preferred_element_type=jnp.float32) + bqkv_ref[0]   # (S, 3D)

    # Columns of wqkv are arranged [Q | K | V], each block head-major.
    def split(block_id):
        base = block_id * D
        return jnp.stack(
            [qkv[:, base + h * dh: base + (h + 1) * dh] for h in range(heads)],
            axis=0)                                                   # (H, S, dh)

    q = split(0)
    k = split(1)
    v = split(2)

    qs = (q * inv_scalar_norm).astype(jnp.bfloat16)   # fold 1/sqrt(d_head) into q
    kb = k.astype(jnp.bfloat16)
    vb = v.astype(jnp.bfloat16)

    # Content scores for all heads in one batched matmul.
    content = jnp.einsum('hid,hjd->hij', qs, kb,
                         preferred_element_type=jnp.float32)          # (H, S, S)

    # Shared relative projection as ONE flat matmul over all heads/tokens
    # (unscaled q, as in the reference model).
    relq = jnp.dot(q.reshape(heads * S, dh).astype(jnp.bfloat16), wrel_ref[...],
                   preferred_element_type=jnp.float32) + brel_ref[...]
    relq = relq.reshape(heads, S, -1)                                 # (H, S, R)

    # Position scores accumulated straight into the score tensor from the
    # host-precomputed Toeplitz band masks: pos[h,i,j] = relq[h,i,clamp(j-i)+W].
    scores = content + madd[None, :, :]                               # (H, S, S)
    bands = bands_ref[...]                                            # (2W+1, S, S)
    for idx in range(r_used):
        scores = scores + relq[:, :, idx:idx + 1] * bands[idx][None, :, :]

    smax = jnp.max(scores, axis=-1, keepdims=True)
    p = jnp.exp(scores - smax)
    denom = jnp.sum(p, axis=-1, keepdims=True)
    attn = (p * (1.0 / denom)).astype(jnp.bfloat16)                   # exact softmax

    ctx = jnp.einsum('hij,hjd->hid', attn, vb,
                     preferred_element_type=jnp.float32)              # (H, S, dh)
    x = x + jnp.concatenate([ctx[h] for h in range(heads)], axis=-1)  # (S, D)

    # ---------------- MLP sub-block (pre-LN, residual) ------------------------
    h2 = _layernorm(x, ln2_g_ref[0], ln2_b_ref[0])
    z = jnp.dot(h2.astype(jnp.bfloat16), w1_ref[0],
                preferred_element_type=jnp.float32) + b1_ref[0]
    z = 0.5 * z * (1.0 + _erf(z * (1.0 / math.sqrt(2.0))))            # exact GELU
    y = jnp.dot(z.astype(jnp.bfloat16), w2_ref[0],
                preferred_element_type=jnp.float32) + b2_ref[0]
    x = x + y
    x_scratch[b] = x

    # ---------------- fused final LN + policy/value heads (last layer only) ---
    @pl.when(l == num_layers - 1)
    def _():
        h0 = _layernorm(x[0:1, :], ng_ref[...], nb_ref[...])          # token 0, (1, D)
        out_ref[0] = jnp.dot(h0.astype(jnp.bfloat16), wh_ref[...],
                             preferred_element_type=jnp.float32) + bh_ref[...]


def _vmem_limit_bytes():
    # v5e/v6e: 128 MiB physical VMEM, v7x: 64 MiB.  Derive the scoped limit from
    # the chip instead of hard-coding 32 MiB, leaving headroom for Mosaic.
    try:
        cap = int(pltpu.get_tpu_info().vmem_capacity_bytes)
        return min(cap * 3 // 4, 96 * 1024 * 1024)
    except Exception:  # older jax or query unsupported
        return 48 * 1024 * 1024


def model_forward(indices, params, heads, rel_window, action_mask=None):
    # Embedding lookup (glue: plain JAX gather); padding_idx=0 row is zero.
    x = params["emb"][indices]                              # (B, S, D) f32
    B, S = indices.shape
    D = x.shape[-1]
    dh = D // heads
    W = rel_window
    R = 2 * W + 3
    L = params["wqkv"].shape[0]
    C1 = params["whead"].shape[-1]                          # n_classes + 1 (value col)

    seq_mask = indices != 0
    madd = jnp.where(seq_mask, 0.0, -1e30).astype(jnp.float32).reshape(B, 1, S)

    # Toeplitz relative-position band masks, built once on the host:
    # bands[r, i, j] = 1.0  iff  clamp(j - i, -W, W) + W == r   (r in [0, 2W]).
    # (The reference gather never reads buckets 2W+1 / 2W+2 of the R=2W+3-wide
    # rel_proj output, so only 2W+1 bands are needed.)
    posn = jnp.arange(S, dtype=jnp.int32)
    delta = jnp.clip(posn[None, :] - posn[:, None], -W, W) + W
    bands = (delta[None, :, :] ==
             jnp.arange(2 * W + 1, dtype=jnp.int32)[:, None, None]
             ).astype(jnp.float32)                          # (2W+1, S, S)

    def per_layer(shape):
        return pl.BlockSpec((1,) + shape, lambda l, b: (l,) + (0,) * len(shape))

    def shared(shape):
        return pl.BlockSpec(shape, lambda l, b: (0,) * len(shape))

    kernel = functools.partial(
        fused_model_kernel, heads=heads, dh=dh, rel_window=rel_window,
        inv_scalar_norm=1.0 / math.sqrt(D / heads))

    out = pl.pallas_call(
        kernel,
        out_shape=jax.ShapeDtypeStruct((B, 1, C1), jnp.float32),
        grid=(L, B),                                        # layer OUTER, batch INNER
        in_specs=[
            # Embeddings: only consumed at l == 0; for l > 0 the index map
            # collapses to block 0, so the block index is unchanged between
            # consecutive steps and Pallas skips the redundant re-DMA.
            pl.BlockSpec((1, S, D), lambda l, b: (jnp.where(l == 0, b, 0), 0, 0)),
            pl.BlockSpec((1, 1, S), lambda l, b: (b, 0, 0)),   # additive key mask
            shared((2 * W + 1, S, S)),                         # Toeplitz band masks
            per_layer((1, D)), per_layer((1, D)),              # ln1 g, b
            per_layer((D, 3 * D)), per_layer((1, 3 * D)),      # wqkv, bqkv
            shared((dh, R)), shared((1, R)),                   # shared rel_proj W, b
            per_layer((1, D)), per_layer((1, D)),              # ln2 g, b
            per_layer((D, 4 * D)), per_layer((1, 4 * D)),      # mlp W1, b1
            per_layer((4 * D, D)), per_layer((1, D)),          # mlp W2, b2
            shared((1, D)), shared((1, D)),                    # final norm g, b
            shared((D, C1)), shared((1, C1)),                  # fused [action|value] head
        ],
        out_specs=pl.BlockSpec((1, 1, C1), lambda l, b: (b, 0, 0)),
        scratch_shapes=[pltpu.VMEM((B, S, D), jnp.float32)],   # layer-resident activations
        compiler_params=pltpu.CompilerParams(
            dimension_semantics=("arbitrary", "parallel"),
            vmem_limit_bytes=_vmem_limit_bytes()),
    )(x, madd, bands,
      params["ln1_g"], params["ln1_b"], params["wqkv"], params["bqkv"],
      params["wrel"], params["brel"],
      params["ln2_g"], params["ln2_b"], params["w1"], params["b1"],
      params["w2"], params["b2"],
      params["norm_g"], params["norm_b"], params["whead"], params["bhead"])

    out = out[:, 0, :]                      # (B, C1)
    logits = out[:, :C1 - 1]
    values = out[:, C1 - 1]
    if action_mask is not None:
        # Model.forward: logits.masked_fill(mask == 0, -inf) (host-side glue).
        logits = jnp.where(action_mask == 0, -jnp.inf, logits)
    return logits, values


def init_params(key, vocab, D, layers, heads, rel_window, n_classes):
    R = 2 * rel_window + 3
    dh = D // heads
    C1 = n_classes + 1
    keys = iter(jax.random.split(key, 8 + 3 * layers))
    s = 0.05

    emb = jax.random.normal(next(keys), (vocab, D), jnp.float32)
    emb = emb.at[0].set(0.0)                # padding_idx=0

    params = dict(
        emb=emb,
        # shared rel_proj (dh, R) — bf16 for the MXU
        wrel=(s * jax.random.normal(next(keys), (dh, R))).astype(jnp.bfloat16),
        brel=jnp.zeros((1, R), jnp.float32),
        norm_g=jnp.ones((1, D), jnp.float32),
        norm_b=jnp.zeros((1, D), jnp.float32),
        # fused head: columns [action logits | value]
        whead=(s * jax.random.normal(next(keys), (D, C1))).astype(jnp.bfloat16),
        bhead=jnp.zeros((1, C1), jnp.float32),
        # per-layer weights stacked on a leading L axis (one fused kernel);
        # wqkv columns are [Q | K | V], each block head-major.
        ln1_g=jnp.ones((layers, 1, D), jnp.float32),
        ln1_b=jnp.zeros((layers, 1, D), jnp.float32),
        wqkv=(s * jax.random.normal(next(keys), (layers, D, 3 * D))).astype(jnp.bfloat16),
        bqkv=jnp.zeros((layers, 1, 3 * D), jnp.float32),
        ln2_g=jnp.ones((layers, 1, D), jnp.float32),
        ln2_b=jnp.zeros((layers, 1, D), jnp.float32),
        w1=(s * jax.random.normal(next(keys), (layers, D, 4 * D))).astype(jnp.bfloat16),
        b1=jnp.zeros((layers, 1, 4 * D), jnp.float32),
        w2=(s * jax.random.normal(next(keys), (layers, 4 * D, D))).astype(jnp.bfloat16),
        b2=jnp.zeros((layers, 1, D), jnp.float32),
    )
    return params


if __name__ == "__main__":
    B, S, D, heads, layers, rel_window = 2, 8, 32, 4, 2, 2
    vocab, n_classes = 50, 10

    key = jax.random.PRNGKey(0)
    pkey, ikey = jax.random.split(key)
    params = init_params(pkey, vocab, D, layers, heads, rel_window, n_classes)

    indices = jax.random.randint(ikey, (B, S), 1, vocab)
    indices = indices.at[1, 6:].set(0)      # pad tail of second sequence

    logits, values = model_forward(indices, params, heads, rel_window)
    jax.block_until_ready((logits, values))
    assert logits.shape == (B, n_classes), logits.shape
    assert values.shape == (B,), values.shape
    assert bool(jnp.all(jnp.isfinite(logits))) and bool(jnp.all(jnp.isfinite(values)))
    print("KERNEL_OK")
</pallas_src>

<mosaic_0001>
module attributes {stable_mosaic.version = 11 : i64} {
  func.func @fused_model_kernel(%arg0: i32, %arg1: i32, %arg2: memref<1x8x32xf32, #tpu.memory_space<vmem>>, %arg3: memref<1x1x8xf32, #tpu.memory_space<vmem>>, %arg4: memref<5x8x8xf32, #tpu.memory_space<vmem>>, %arg5: memref<1x1x32xf32, #tpu.memory_space<vmem>>, %arg6: memref<1x1x32xf32, #tpu.memory_space<vmem>>, %arg7: memref<1x32x96xbf16, #tpu.memory_space<vmem>>, %arg8: memref<1x1x96xf32, #tpu.memory_space<vmem>>, %arg9: memref<8x7xbf16, #tpu.memory_space<vmem>>, %arg10: memref<1x7xf32, #tpu.memory_space<vmem>>, %arg11: memref<1x1x32xf32, #tpu.memory_space<vmem>>, %arg12: memref<1x1x32xf32, #tpu.memory_space<vmem>>, %arg13: memref<1x32x128xbf16, #tpu.memory_space<vmem>>, %arg14: memref<1x1x128xf32, #tpu.memory_space<vmem>>, %arg15: memref<1x128x32xbf16, #tpu.memory_space<vmem>>, %arg16: memref<1x1x32xf32, #tpu.memory_space<vmem>>, %arg17: memref<1x32xf32, #tpu.memory_space<vmem>>, %arg18: memref<1x32xf32, #tpu.memory_space<vmem>>, %arg19: memref<32x11xbf16, #tpu.memory_space<vmem>>, %arg20: memref<1x11xf32, #tpu.memory_space<vmem>>, %arg21: memref<1x1x11xf32, #tpu.memory_space<vmem>>, %arg22: memref<2x8x32xf32, #tpu.memory_space<vmem>>) attributes {dimension_semantics = [#tpu.dimension_semantics<arbitrary>, #tpu.dimension_semantics<parallel>], iteration_bounds = array<i64: 2, 2>, scalar_prefetch = 0 : i64, scratch_operands = 1 : i64, tpu.core_type = #tpu.core_type<tc>, window_params = [{transform_indices = @transform_0, window_bounds = array<i64: 1, 8, 32>}, {transform_indices = @transform_1, window_bounds = array<i64: 1, 1, 8>}, {pipeline_mode = #tpu.pipeline_mode<synchronous>, transform_indices = @transform_2, window_bounds = array<i64: 5, 8, 8>}, {transform_indices = @transform_3, window_bounds = array<i64: 1, 1, 32>}, {transform_indices = @transform_4, window_bounds = array<i64: 1, 1, 32>}, {transform_indices = @transform_5, window_bounds = array<i64: 1, 32, 96>}, {transform_indices = @transform_6, window_bounds = array<i64: 1, 1, 96>}, {pipeline_mode = #tpu.pipeline_mode<synchronous>, transform_indices = @transform_7, window_bounds = array<i64: 8, 7>}, {pipeline_mode = #tpu.pipeline_mode<synchronous>, transform_indices = @transform_8, window_bounds = array<i64: 1, 7>}, {transform_indices = @transform_9, window_bounds = array<i64: 1, 1, 32>}, {transform_indices = @transform_10, window_bounds = array<i64: 1, 1, 32>}, {transform_indices = @transform_11, window_bounds = array<i64: 1, 32, 128>}, {transform_indices = @transform_12, window_bounds = array<i64: 1, 1, 128>}, {transform_indices = @transform_13, window_bounds = array<i64: 1, 128, 32>}, {transform_indices = @transform_14, window_bounds = array<i64: 1, 1, 32>}, {pipeline_mode = #tpu.pipeline_mode<synchronous>, transform_indices = @transform_15, window_bounds = array<i64: 1, 32>}, {pipeline_mode = #tpu.pipeline_mode<synchronous>, transform_indices = @transform_16, window_bounds = array<i64: 1, 32>}, {pipeline_mode = #tpu.pipeline_mode<synchronous>, transform_indices = @transform_17, window_bounds = array<i64: 32, 11>}, {pipeline_mode = #tpu.pipeline_mode<synchronous>, transform_indices = @transform_18, window_bounds = array<i64: 1, 11>}, {transform_indices = @transform_19, window_bounds = array<i64: 1, 1, 11>}]} {
    %c0_i32 = arith.constant 0 : i32
    %0 = arith.cmpi eq, %arg0, %c0_i32 : i32
    %1 = arith.extui %0 : i1 to i32
    %c0_i32_0 = arith.constant 0 : i32
    %2 = arith.cmpi ne, %1, %c0_i32_0 : i32
    scf.if %2 {
      %c0_80 = arith.constant 0 : index
      %c0_81 = arith.constant 0 : index
      %c0_82 = arith.constant 0 : index
      %241 = vector.load %arg2[%c0_80, %c0_81, %c0_82] : memref<1x8x32xf32, #tpu.memory_space<vmem>>, vector<1x8x32xf32>
      %242 = vector.shape_cast %241 : vector<1x8x32xf32> to vector<8x32xf32>
      %243 = arith.index_cast %arg1 : i32 to index
      %c0_83 = arith.constant 0 : index
      %c0_84 = arith.constant 0 : index
      %244 = vector.load %arg22[%243, %c0_83, %c0_84] : memref<2x8x32xf32, #tpu.memory_space<vmem>>, vector<1x8x32xf32>
      %245 = vector.shape_cast %244 : vector<1x8x32xf32> to vector<8x32xf32>
      %246 = vector.shape_cast %242 : vector<8x32xf32> to vector<1x8x32xf32>
      tpu.vector_store %arg22[%243, %c0_83, %c0_84], %246 {strides = array<i32>} : memref<2x8x32xf32, #tpu.memory_space<vmem>>, vector<1x8x32xf32>,
    } else {
    }
    %3 = arith.index_cast %arg1 : i32 to index
    %c0 = arith.constant 0 : index
    %c0_1 = arith.constant 0 : index
    %4 = vector.load %arg22[%3, %c0, %c0_1] : memref<2x8x32xf32, #tpu.memory_space<vmem>>, vector<1x8x32xf32>
    %5 = vector.shape_cast %4 : vector<1x8x32xf32> to vector<8x32xf32>
    %c0_2 = arith.constant 0 : index
    %c0_3 = arith.constant 0 : index
    %c0_4 = arith.constant 0 : index
    %6 = vector.load %arg3[%c0_2, %c0_3, %c0_4] : memref<1x1x8xf32, #tpu.memory_space<vmem>>, vector<1x1x8xf32>
    %7 = vector.shape_cast %6 : vector<1x1x8xf32> to vector<1x8xf32>
    %c0_5 = arith.constant 0 : index
    %c0_6 = arith.constant 0 : index
    %c0_7 = arith.constant 0 : index
    %8 = vector.load %arg5[%c0_5, %c0_6, %c0_7] : memref<1x1x32xf32, #tpu.memory_space<vmem>>, vector<1x1x32xf32>
    %9 = vector.shape_cast %8 : vector<1x1x32xf32> to vector<1x32xf32>
    %c0_8 = arith.constant 0 : index
    %c0_9 = arith.constant 0 : index
    %c0_10 = arith.constant 0 : index
    %10 = vector.load %arg6[%c0_8, %c0_9, %c0_10] : memref<1x1x32xf32, #tpu.memory_space<vmem>>, vector<1x1x32xf32>
    %11 = vector.shape_cast %10 : vector<1x1x32xf32> to vector<1x32xf32>
    %cst = arith.constant dense<0.000000e+00> : vector<8xf32>
    %12 = vector.multi_reduction <add>, %5, %cst [1] : vector<8x32xf32> to vector<8xf32>
    %13 = vector.shape_cast %12 : vector<8xf32> to vector<8x1xf32>
    %cst_11 = arith.constant 3.200000e+01 : f32
    %14 = vector.broadcast %cst_11 : f32 to vector<8x1xf32>
    %15 = arith.divf %13, %14 : vector<8x1xf32>
    %16 = vector.broadcast %15 : vector<8x1xf32> to vector<8x32xf32>
    %17 = arith.subf %5, %16 : vector<8x32xf32>
    %18 = arith.mulf %17, %17 : vector<8x32xf32>
    %cst_12 = arith.constant dense<0.000000e+00> : vector<8xf32>
    %19 = vector.multi_reduction <add>, %18, %cst_12 [1] : vector<8x32xf32> to vector<8xf32>
    %20 = vector.shape_cast %19 : vector<8xf32> to vector<8x1xf32>
    %cst_13 = arith.constant 3.200000e+01 : f32
    %21 = vector.broadcast %cst_13 : f32 to vector<8x1xf32>
    %22 = arith.divf %20, %21 : vector<8x1xf32>
    %23 = vector.broadcast %15 : vector<8x1xf32> to vector<8x32xf32>
    %24 = arith.subf %5, %23 : vector<8x32xf32>
    %cst_14 = arith.constant 9.99999997E-7 : f32
    %25 = vector.broadcast %cst_14 : f32 to vector<8x1xf32>
    %26 = arith.addf %22, %25 : vector<8x1xf32>
    %27 = math.rsqrt %26 : vector<8x1xf32>
    %28 = vector.broadcast %27 : vector<8x1xf32> to vector<8x32xf32>
    %29 = arith.mulf %24, %28 : vector<8x32xf32>
    %30 = vector.broadcast %9 : vector<1x32xf32> to vector<8x32xf32>
    %31 = arith.mulf %29, %30 : vector<8x32xf32>
    %32 = vector.broadcast %11 : vector<1x32xf32> to vector<8x32xf32>
    %33 = arith.addf %31, %32 : vector<8x32xf32>
    %34 = arith.truncf %33 : vector<8x32xf32> to vector<8x32xbf16>
    %c0_15 = arith.constant 0 : index
    %c0_16 = arith.constant 0 : index
    %c0_17 = arith.constant 0 : index
    %35 = vector.load %arg7[%c0_15, %c0_16, %c0_17] : memref<1x32x96xbf16, #tpu.memory_space<vmem>>, vector<1x32x96xbf16>
    %36 = vector.shape_cast %35 : vector<1x32x96xbf16> to vector<32x96xbf16>
    %cst_18 = arith.constant dense<0.000000e+00> : vector<8x96xf32>
    %37 = tpu.matmul %34, %36, %cst_18 {dimension_numbers = #tpu.dot_dimension_numbers<[1], [0], [0], [1], [0, 0, 1, 1], [], []>} : vector<8x32xbf16>, vector<32x96xbf16>, vector<8x96xf32> -> vector<8x96xf32>
    %c0_19 = arith.constant 0 : index
    %c0_20 = arith.constant 0 : index
    %c0_21 = arith.constant 0 : index
    %38 = vector.load %arg8[%c0_19, %c0_20, %c0_21] : memref<1x1x96xf32, #tpu.memory_space<vmem>>, vector<1x1x96xf32>
    %39 = vector.shape_cast %38 : vector<1x1x96xf32> to vector<1x96xf32>
    %40 = vector.broadcast %39 : vector<1x96xf32> to vector<8x96xf32>
    %41 = arith.addf %37, %40 : vector<8x96xf32>
    %42 = vector.extract_strided_slice %41 {offsets = [0, 0], sizes = [8, 8], strides = [1, 1]} : vector<8x96xf32> to vector<8x8xf32>
    %43 = vector.extract_strided_slice %41 {offsets = [0, 8], sizes = [8, 8], strides = [1, 1]} : vector<8x96xf32> to vector<8x8xf32>
    %44 = vector.extract_strided_slice %41 {offsets = [0, 16], sizes = [8, 8], strides = [1, 1]} : vector<8x96xf32> to vector<8x8xf32>
    %45 = vector.extract_strided_slice %41 {offsets = [0, 24], sizes = [8, 8], strides = [1, 1]} : vector<8x96xf32> to vector<8x8xf32>
    %46 = vector.shape_cast %42 : vector<8x8xf32> to vector<1x8x8xf32>
    %47 = vector.shape_cast %43 : vector<8x8xf32> to vector<1x8x8xf32>
    %48 = vector.shape_cast %44 : vector<8x8xf32> to vector<1x8x8xf32>
    %49 = vector.shape_cast %45 : vector<8x8xf32> to vector<1x8x8xf32>
    %50 = tpu.concatenate %46, %47, %48, %49 in 0 : vector<1x8x8xf32>, vector<1x8x8xf32>, vector<1x8x8xf32>, vector<1x8x8xf32> -> vector<4x8x8xf32>
    %51 = vector.extract_strided_slice %41 {offsets = [0, 32], sizes = [8, 8], strides = [1, 1]} : vector<8x96xf32> to vector<8x8xf32>
    %52 = vector.extract_strided_slice %41 {offsets = [0, 40], sizes = [8, 8], strides = [1, 1]} : vector<8x96xf32> to vector<8x8xf32>
    %53 = vector.extract_strided_slice %41 {offsets = [0, 48], sizes = [8, 8], strides = [1, 1]} : vector<8x96xf32> to vector<8x8xf32>
    %54 = vector.extract_strided_slice %41 {offsets = [0, 56], sizes = [8, 8], strides = [1, 1]} : vector<8x96xf32> to vector<8x8xf32>
    %55 = vector.shape_cast %51 : vector<8x8xf32> to vector<1x8x8xf32>
    %56 = vector.shape_cast %52 : vector<8x8xf32> to vector<1x8x8xf32>
    %57 = vector.shape_cast %53 : vector<8x8xf32> to vector<1x8x8xf32>
    %58 = vector.shape_cast %54 : vector<8x8xf32> to vector<1x8x8xf32>
    %59 = tpu.concatenate %55, %56, %57, %58 in 0 : vector<1x8x8xf32>, vector<1x8x8xf32>, vector<1x8x8xf32>, vector<1x8x8xf32> -> vector<4x8x8xf32>
    %60 = vector.extract_strided_slice %41 {offsets = [0, 64], sizes = [8, 8], strides = [1, 1]} : vector<8x96xf32> to vector<8x8xf32>
    %61 = vector.extract_strided_slice %41 {offsets = [0, 72], sizes = [8, 8], strides = [1, 1]} : vector<8x96xf32> to vector<8x8xf32>
    %62 = vector.extract_strided_slice %41 {offsets = [0, 80], sizes = [8, 8], strides = [1, 1]} : vector<8x96xf32> to vector<8x8xf32>
    %63 = vector.extract_strided_slice %41 {offsets = [0, 88], sizes = [8, 8], strides = [1, 1]} : vector<8x96xf32> to vector<8x8xf32>
    %64 = vector.shape_cast %60 : vector<8x8xf32> to vector<1x8x8xf32>
    %65 = vector.shape_cast %61 : vector<8x8xf32> to vector<1x8x8xf32>
    %66 = vector.shape_cast %62 : vector<8x8xf32> to vector<1x8x8xf32>
    %67 = vector.shape_cast %63 : vector<8x8xf32> to vector<1x8x8xf32>
    %68 = tpu.concatenate %64, %65, %66, %67 in 0 : vector<1x8x8xf32>, vector<1x8x8xf32>, vector<1x8x8xf32>, vector<1x8x8xf32> -> vector<4x8x8xf32>
    %cst_22 = arith.constant 0.353553385 : f32
    %69 = vector.broadcast %cst_22 : f32 to vector<4x8x8xf32>
    %70 = arith.mulf %50, %69 : vector<4x8x8xf32>
    %71 = arith.truncf %70 : vector<4x8x8xf32> to vector<4x8x8xbf16>
    %72 = arith.truncf %59 : vector<4x8x8xf32> to vector<4x8x8xbf16>
    %73 = arith.truncf %68 : vector<4x8x8xf32> to vector<4x8x8xbf16>
    "tpu.trace_start"() <{level = 10 : i32, message = "hid,hjd->hij"}> : () -> ()
    %cst_23 = arith.constant dense<0.000000e+00> : vector<4x8x8xf32>
    %74 = tpu.matmul %71, %72, %cst_23 {dimension_numbers = #tpu.dot_dimension_numbers<[2], [2], [1], [1], [0, 0, 0, 1, 1, 1], [0], [0]>} : vector<4x8x8xbf16>, vector<4x8x8xbf16>, vector<4x8x8xf32> -> vector<4x8x8xf32>
    "tpu.trace_stop"() : () -> ()
    %75 = vector.shape_cast %50 : vector<4x8x8xf32> to vector<32x8xf32>
    %76 = arith.truncf %75 : vector<32x8xf32> to vector<32x8xbf16>
    %c0_24 = arith.constant 0 : index
    %c0_25 = arith.constant 0 : index
    %77 = vector.load %arg9[%c0_24, %c0_25] : memref<8x7xbf16, #tpu.memory_space<vmem>>, vector<8x7xbf16>
    %cst_26 = arith.constant dense<0.000000e+00> : vector<32x7xf32>
    %78 = tpu.matmul %76, %77, %cst_26 {dimension_numbers = #tpu.dot_dimension_numbers<[1], [0], [0], [1], [0, 0, 1, 1], [], []>} : vector<32x8xbf16>, vector<8x7xbf16>, vector<32x7xf32> -> vector<32x7xf32>
    %c0_27 = arith.constant 0 : index
    %c0_28 = arith.constant 0 : index
    %79 = vector.load %arg10[%c0_27, %c0_28] : memref<1x7xf32, #tpu.memory_space<vmem>>, vector<1x7xf32>
    %80 = vector.broadcast %79 : vector<1x7xf32> to vector<32x7xf32>
    %81 = arith.addf %78, %80 : vector<32x7xf32>
    %82 = vector.shape_cast %81 : vector<32x7xf32> to vector<4x8x7xf32>
    %83 = vector.shape_cast %7 : vector<1x8xf32> to vector<1x1x8xf32>
    %84 = vector.broadcast %83 : vector<1x1x8xf32> to vector<4x8x8xf32>
    %85 = arith.addf %74, %84 : vector<4x8x8xf32>
    %c0_29 = arith.constant 0 : index
    %c0_30 = arith.constant 0 : index
    %c0_31 = arith.constant 0 : index
    %86 = vector.load %arg4[%c0_29, %c0_30, %c0_31] : memref<5x8x8xf32, #tpu.memory_space<vmem>>, vector<5x8x8xf32>
    %87 = vector.extract_strided_slice %82 {offsets = [0, 0, 0], sizes = [4, 8, 1], strides = [1, 1, 1]} : vector<4x8x7xf32> to vector<4x8x1xf32>
    %88 = vector.extract_strided_slice %86 {offsets = [0, 0, 0], sizes = [1, 8, 8], strides = [1, 1, 1]} : vector<5x8x8xf32> to vector<1x8x8xf32>
    %89 = vector.shape_cast %88 : vector<1x8x8xf32> to vector<8x8xf32>
    %90 = vector.shape_cast %89 : vector<8x8xf32> to vector<1x8x8xf32>
    %91 = vector.broadcast %87 : vector<4x8x1xf32> to vector<4x8x8xf32>
    %92 = vector.broadcast %90 : vector<1x8x8xf32> to vector<4x8x8xf32>
    %93 = arith.mulf %91, %92 : vector<4x8x8xf32>
    %94 = arith.addf %85, %93 : vector<4x8x8xf32>
    %95 = vector.extract_strided_slice %82 {offsets = [0, 0, 1], sizes = [4, 8, 1], strides = [1, 1, 1]} : vector<4x8x7xf32> to vector<4x8x1xf32>
    %96 = vector.extract_strided_slice %86 {offsets = [1, 0, 0], sizes = [1, 8, 8], strides = [1, 1, 1]} : vector<5x8x8xf32> to vector<1x8x8xf32>
    %97 = vector.shape_cast %96 : vector<1x8x8xf32> to vector<8x8xf32>
    %98 = vector.shape_cast %97 : vector<8x8xf32> to vector<1x8x8xf32>
    %99 = vector.broadcast %95 : vector<4x8x1xf32> to vector<4x8x8xf32>
    %100 = vector.broadcast %98 : vector<1x8x8xf32> to vector<4x8x8xf32>
    %101 = arith.mulf %99, %100 : vector<4x8x8xf32>
    %102 = arith.addf %94, %101 : vector<4x8x8xf32>
    %103 = vector.extract_strided_slice %82 {offsets = [0, 0, 2], sizes = [4, 8, 1], strides = [1, 1, 1]} : vector<4x8x7xf32> to vector<4x8x1xf32>
    %104 = vector.extract_strided_slice %86 {offsets = [2, 0, 0], sizes = [1, 8, 8], strides = [1, 1, 1]} : vector<5x8x8xf32> to vector<1x8x8xf32>
    %105 = vector.shape_cast %104 : vector<1x8x8xf32> to vector<8x8xf32>
    %106 = vector.shape_cast %105 : vector<8x8xf32> to vector<1x8x8xf32>
    %107 = vector.broadcast %103 : vector<4x8x1xf32> to vector<4x8x8xf32>
    %108 = vector.broadcast %106 : vector<1x8x8xf32> to vector<4x8x8xf32>
    %109 = arith.mulf %107, %108 : vector<4x8x8xf32>
    %110 = arith.addf %102, %109 : vector<4x8x8xf32>
    %111 = vector.extract_strided_slice %82 {offsets = [0, 0, 3], sizes = [4, 8, 1], strides = [1, 1, 1]} : vector<4x8x7xf32> to vector<4x8x1xf32>
    %112 = vector.extract_strided_slice %86 {offsets = [3, 0, 0], sizes = [1, 8, 8], strides = [1, 1, 1]} : vector<5x8x8xf32> to vector<1x8x8xf32>
    %113 = vector.shape_cast %112 : vector<1x8x8xf32> to vector<8x8xf32>
    %114 = vector.shape_cast %113 : vector<8x8xf32> to vector<1x8x8xf32>
    %115 = vector.broadcast %111 : vector<4x8x1xf32> to vector<4x8x8xf32>
    %116 = vector.broadcast %114 : vector<1x8x8xf32> to vector<4x8x8xf32>
    %117 = arith.mulf %115, %116 : vector<4x8x8xf32>
    %118 = arith.addf %110, %117 : vector<4x8x8xf32>
    %119 = vector.extract_strided_slice %82 {offsets = [0, 0, 4], sizes = [4, 8, 1], strides = [1, 1, 1]} : vector<4x8x7xf32> to vector<4x8x1xf32>
    %120 = vector.extract_strided_slice %86 {offsets = [4, 0, 0], sizes = [1, 8, 8], strides = [1, 1, 1]} : vector<5x8x8xf32> to vector<1x8x8xf32>
    %121 = vector.shape_cast %120 : vector<1x8x8xf32> to vector<8x8xf32>
    %122 = vector.shape_cast %121 : vector<8x8xf32> to vector<1x8x8xf32>
    %123 = vector.broadcast %119 : vector<4x8x1xf32> to vector<4x8x8xf32>
    %124 = vector.broadcast %122 : vector<1x8x8xf32> to vector<4x8x8xf32>
    %125 = arith.mulf %123, %124 : vector<4x8x8xf32>
    %126 = arith.addf %118, %125 : vector<4x8x8xf32>
    %cst_32 = arith.constant dense<0xFF800000> : vector<4x8xf32>
    %127 = vector.multi_reduction <maximumf>, %126, %cst_32 [2] : vector<4x8x8xf32> to vector<4x8xf32>
    %128 = vector.shape_cast %127 : vector<4x8xf32> to vector<4x8x1xf32>
    %129 = vector.broadcast %128 : vector<4x8x1xf32> to vector<4x8x8xf32>
    %130 = arith.subf %126, %129 : vector<4x8x8xf32>
    %131 = math.exp %130 : vector<4x8x8xf32>
    %cst_33 = arith.constant dense<0.000000e+00> : vector<4x8xf32>
    %132 = vector.multi_reduction <add>, %131, %cst_33 [2] : vector<4x8x8xf32> to vector<4x8xf32>
    %133 = vector.shape_cast %132 : vector<4x8xf32> to vector<4x8x1xf32>
    %cst_34 = arith.constant 1.000000e+00 : f32
    %134 = vector.broadcast %cst_34 : f32 to vector<4x8x1xf32>
    %135 = arith.divf %134, %133 : vector<4x8x1xf32>
    %136 = vector.broadcast %135 : vector<4x8x1xf32> to vector<4x8x8xf32>
    %137 = arith.mulf %131, %136 : vector<4x8x8xf32>
    %138 = arith.truncf %137 : vector<4x8x8xf32> to vector<4x8x8xbf16>
    "tpu.trace_start"() <{level = 10 : i32, message = "hij,hjd->hid"}> : () -> ()
    %cst_35 = arith.constant dense<0.000000e+00> : vector<4x8x8xf32>
    %139 = tpu.matmul %138, %73, %cst_35 {dimension_numbers = #tpu.dot_dimension_numbers<[2], [1], [1], [2], [0, 0, 0, 1, 1, 2], [0], [0]>} : vector<4x8x8xbf16>, vector<4x8x8xbf16>, vector<4x8x8xf32> -> vector<4x8x8xf32>
    "tpu.trace_stop"() : () -> ()
    %140 = vector.extract_strided_slice %139 {offsets = [0, 0, 0], sizes = [1, 8, 8], strides = [1, 1, 1]} : vector<4x8x8xf32> to vector<1x8x8xf32>
    %141 = vector.shape_cast %140 : vector<1x8x8xf32> to vector<8x8xf32>
    %142 = vector.extract_strided_slice %139 {offsets = [1, 0, 0], sizes = [1, 8, 8], strides = [1, 1, 1]} : vector<4x8x8xf32> to vector<1x8x8xf32>
    %143 = vector.shape_cast %142 : vector<1x8x8xf32> to vector<8x8xf32>
    %144 = vector.extract_strided_slice %139 {offsets = [2, 0, 0], sizes = [1, 8, 8], strides = [1, 1, 1]} : vector<4x8x8xf32> to vector<1x8x8xf32>
    %145 = vector.shape_cast %144 : vector<1x8x8xf32> to vector<8x8xf32>
    %146 = vector.extract_strided_slice %139 {offsets = [3, 0, 0], sizes = [1, 8, 8], strides = [1, 1, 1]} : vector<4x8x8xf32> to vector<1x8x8xf32>
    %147 = vector.shape_cast %146 : vector<1x8x8xf32> to vector<8x8xf32>
    %148 = tpu.concatenate %141, %143, %145, %147 in 1 : vector<8x8xf32>, vector<8x8xf32>, vector<8x8xf32>, vector<8x8xf32> -> vector<8x32xf32>
    %149 = arith.addf %5, %148 : vector<8x32xf32>
    %c0_36 = arith.constant 0 : index
    %c0_37 = arith.constant 0 : index
    %c0_38 = arith.constant 0 : index
    %150 = vector.load %arg11[%c0_36, %c0_37, %c0_38] : memref<1x1x32xf32, #tpu.memory_space<vmem>>, vector<1x1x32xf32>
    %151 = vector.shape_cast %150 : vector<1x1x32xf32> to vector<1x32xf32>
    %c0_39 = arith.constant 0 : index
    %c0_40 = arith.constant 0 : index
    %c0_41 = arith.constant 0 : index
    %152 = vector.load %arg12[%c0_39, %c0_40, %c0_41] : memref<1x1x32xf32, #tpu.memory_space<vmem>>, vector<1x1x32xf32>
    %153 = vector.shape_cast %152 : vector<1x1x32xf32> to vector<1x32xf32>
    %cst_42 = arith.constant dense<0.000000e+00> : vector<8xf32>
    %154 = vector.multi_reduction <add>, %149, %cst_42 [1] : vector<8x32xf32> to vector<8xf32>
    %155 = vector.shape_cast %154 : vector<8xf32> to vector<8x1xf32>
    %cst_43 = arith.constant 3.200000e+01 : f32
    %156 = vector.broadcast %cst_43 : f32 to vector<8x1xf32>
    %157 = arith.divf %155, %156 : vector<8x1xf32>
    %158 = vector.broadcast %157 : vector<8x1xf32> to vector<8x32xf32>
    %159 = arith.subf %149, %158 : vector<8x32xf32>
    %160 = arith.mulf %159, %159 : vector<8x32xf32>
    %cst_44 = arith.constant dense<0.000000e+00> : vector<8xf32>
    %161 = vector.multi_reduction <add>, %160, %cst_44 [1] : vector<8x32xf32> to vector<8xf32>
    %162 = vector.shape_cast %161 : vector<8xf32> to vector<8x1xf32>
    %cst_45 = arith.constant 3.200000e+01 : f32
    %163 = vector.broadcast %cst_45 : f32 to vector<8x1xf32>
    %164 = arith.divf %162, %163 : vector<8x1xf32>
    %165 = vector.broadcast %157 : vector<8x1xf32> to vector<8x32xf32>
    %166 = arith.subf %149, %165 : vector<8x32xf32>
    %cst_46 = arith.constant 9.99999997E-7 : f32
    %167 = vector.broadcast %cst_46 : f32 to vector<8x1xf32>
    %168 = arith.addf %164, %167 : vector<8x1xf32>
    %169 = math.rsqrt %168 : vector<8x1xf32>
    %170 = vector.broadcast %169 : vector<8x1xf32> to vector<8x32xf32>
    %171 = arith.mulf %166, %170 : vector<8x32xf32>
    %172 = vector.broadcast %151 : vector<1x32xf32> to vector<8x32xf32>
    %173 = arith.mulf %171, %172 : vector<8x32xf32>
    %174 = vector.broadcast %153 : vector<1x32xf32> to vector<8x32xf32>
    %175 = arith.addf %173, %174 : vector<8x32xf32>
    %176 = arith.truncf %175 : vector<8x32xf32> to vector<8x32xbf16>
    %c0_47 = arith.constant 0 : index
    %c0_48 = arith.constant 0 : index
    %c0_49 = arith.constant 0 : index
    %177 = vector.load %arg13[%c0_47, %c0_48, %c0_49] : memref<1x32x128xbf16, #tpu.memory_space<vmem>>, vector<1x32x128xbf16>
    %178 = vector.shape_cast %177 : vector<1x32x128xbf16> to vector<32x128xbf16>
    %cst_50 = arith.constant dense<0.000000e+00> : vector<8x128xf32>
    %179 = tpu.matmul %176, %178, %cst_50 {dimension_numbers = #tpu.dot_dimension_numbers<[1], [0], [0], [1], [0, 0, 1, 1], [], []>} : vector<8x32xbf16>, vector<32x128xbf16>, vector<8x128xf32> -> vector<8x128xf32>
    %c0_51 = arith.constant 0 : index
    %c0_52 = arith.constant 0 : index
    %c0_53 = arith.constant 0 : index
    %180 = vector.load %arg14[%c0_51, %c0_52, %c0_53] : memref<1x1x128xf32, #tpu.memory_space<vmem>>, vector<1x1x128xf32>
    %181 = vector.shape_cast %180 : vector<1x1x128xf32> to vector<1x128xf32>
    %182 = vector.broadcast %181 : vector<1x128xf32> to vector<8x128xf32>
    %183 = arith.addf %179, %182 : vector<8x128xf32>
    %cst_54 = arith.constant 5.000000e-01 : f32
    %184 = vector.broadcast %cst_54 : f32 to vector<8x128xf32>
    %185 = arith.mulf %184, %183 : vector<8x128xf32>
    %cst_55 = arith.constant 0.707106769 : f32
    %186 = vector.broadcast %cst_55 : f32 to vector<8x128xf32>
    %187 = arith.mulf %183, %186 : vector<8x128xf32>
    %cst_56 = arith.constant 0.000000e+00 : f32
    %188 = vector.broadcast %cst_56 : f32 to vector<8x128xf32>
    %189 = arith.cmpf oge, %187, %188 : vector<8x128xf32>
    %cst_57 = arith.constant 1.000000e+00 : f32
    %cst_58 = arith.constant -1.000000e+00 : f32
    %190 = vector.broadcast %cst_57 : f32 to vector<8x128xf32>
    %191 = vector.broadcast %cst_58 : f32 to vector<8x128xf32>
    %192 = arith.select %189, %190, %191 : vector<8x128xi1>, vector<8x128xf32>
    %193 = math.absf %187 : vector<8x128xf32>
    %cst_59 = arith.constant 0.327591091 : f32
    %194 = vector.broadcast %cst_59 : f32 to vector<8x128xf32>
    %195 = arith.mulf %194, %193 : vector<8x128xf32>
    %cst_60 = arith.constant 1.000000e+00 : f32
    %196 = vector.broadcast %cst_60 : f32 to vector<8x128xf32>
    %197 = arith.addf %196, %195 : vector<8x128xf32>
    %cst_61 = arith.constant 1.000000e+00 : f32
    %198 = vector.broadcast %cst_61 : f32 to vector<8x128xf32>
    %199 = arith.divf %198, %197 : vector<8x128xf32>
    %cst_62 = arith.constant 1.06140542 : f32
    %200 = vector.broadcast %cst_62 : f32 to vector<8x128xf32>
    %201 = arith.mulf %200, %199 : vector<8x128xf32>
    %cst_63 = arith.constant -1.45315206 : f32
    %202 = vector.broadcast %cst_63 : f32 to vector<8x128xf32>
    %203 = arith.addf %201, %202 : vector<8x128xf32>
    %204 = arith.mulf %203, %199 : vector<8x128xf32>
    %cst_64 = arith.constant 1.42141378 : f32
    %205 = vector.broadcast %cst_64 : f32 to vector<8x128xf32>
    %206 = arith.addf %204, %205 : vector<8x128xf32>
    %207 = arith.mulf %206, %199 : vector<8x128xf32>
    %cst_65 = arith.constant -0.284496725 : f32
    %208 = vector.broadcast %cst_65 : f32 to vector<8x128xf32>
    %209 = arith.addf %207, %208 : vector<8x128xf32>
    %210 = arith.mulf %209, %199 : vector<8x128xf32>
    %cst_66 = arith.constant 0.254829586 : f32
    %211 = vector.broadcast %cst_66 : f32 to vector<8x128xf32>
    %212 = arith.addf %210, %211 : vector<8x128xf32>
    %213 = arith.mulf %212, %199 : vector<8x128xf32>
    %cst_67 = arith.constant 0.000000e+00 : f32
    %214 = vector.broadcast %cst_67 : f32 to vector<8x128xf32>
    %215 = arith.subf %214, %193 : vector<8x128xf32>
    %216 = arith.mulf %215, %193 : vector<8x128xf32>
    %217 = math.exp %216 : vector<8x128xf32>
    %218 = arith.mulf %213, %217 : vector<8x128xf32>
    %cst_68 = arith.constant 1.000000e+00 : f32
    %219 = vector.broadcast %cst_68 : f32 to vector<8x128xf32>
    %220 = arith.subf %219, %218 : vector<8x128xf32>
    %221 = arith.mulf %192, %220 : vector<8x128xf32>
    %cst_69 = arith.constant 1.000000e+00 : f32
    %222 = vector.broadcast %cst_69 : f32 to vector<8x128xf32>
    %223 = arith.addf %222, %221 : vector<8x128xf32>
    %224 = arith.mulf %185, %223 : vector<8x128xf32>
    %225 = arith.truncf %224 : vector<8x128xf32> to vector<8x128xbf16>
    %c0_70 = arith.constant 0 : index
    %c0_71 = arith.constant 0 : index
    %c0_72 = arith.constant 0 : index
    %226 = vector.load %arg15[%c0_70, %c0_71, %c0_72] : memref<1x128x32xbf16, #tpu.memory_space<vmem>>, vector<1x128x32xbf16>
    %227 = vector.shape_cast %226 : vector<1x128x32xbf16> to vector<128x32xbf16>
    %cst_73 = arith.constant dense<0.000000e+00> : vector<8x32xf32>
    %228 = tpu.matmul %225, %227, %cst_73 {dimension_numbers = #tpu.dot_dimension_numbers<[1], [0], [0], [1], [0, 0, 1, 1], [], []>} : vector<8x128xbf16>, vector<128x32xbf16>, vector<8x32xf32> -> vector<8x32xf32>
    %c0_74 = arith.constant 0 : index
    %c0_75 = arith.constant 0 : index
    %c0_76 = arith.constant 0 : index
    %229 = vector.load %arg16[%c0_74, %c0_75, %c0_76] : memref<1x1x32xf32, #tpu.memory_space<vmem>>, vector<1x1x32xf32>
    %230 = vector.shape_cast %229 : vector<1x1x32xf32> to vector<1x32xf32>
    %231 = vector.broadcast %230 : vector<1x32xf32> to vector<8x32xf32>
    %232 = arith.addf %228, %231 : vector<8x32xf32>
    %233 = arith.addf %149, %232 : vector<8x32xf32>
    %234 = arith.index_cast %arg1 : i32 to index
    %c0_77 = arith.constant 0 : index
    %c0_78 = arith.constant 0 : index
    %235 = vector.load %arg22[%234, %c0_77, %c0_78] : memref<2x8x32xf32, #tpu.memory_space<vmem>>, vector<1x8x32xf32>
    %236 = vector.shape_cast %235 : vector<1x8x32xf32> to vector<8x32xf32>
    %237 = vector.shape_cast %233 : vector<8x32xf32> to vector<1x8x32xf32>
    tpu.vector_store %arg22[%234, %c0_77, %c0_78], %237 {strides = array<i32>} : memref<2x8x32xf32, #tpu.memory_space<vmem>>, vector<1x8x32xf32>,
    %c1_i32 = arith.constant 1 : i32
    %238 = arith.cmpi eq, %arg0, %c1_i32 : i32
    %239 = arith.extui %238 : i1 to i32
    %c0_i32_79 = arith.constant 0 : i32
    %240 = arith.cmpi ne, %239, %c0_i32_79 : i32
    scf.if %240 {
      %241 = vector.extract_strided_slice %233 {offsets = [0, 0], sizes = [1, 32], strides = [1, 1]} : vector<8x32xf32> to vector<1x32xf32>
      %c0_80 = arith.constant 0 : index
      %c0_81 = arith.constant 0 : index
      %242 = vector.load %arg17[%c0_80, %c0_81] : memref<1x32xf32, #tpu.memory_space<vmem>>, vector<1x32xf32>
      %c0_82 = arith.constant 0 : index
      %c0_83 = arith.constant 0 : index
      %243 = vector.load %arg18[%c0_82, %c0_83] : memref<1x32xf32, #tpu.memory_space<vmem>>, vector<1x32xf32>
      %cst_84 = arith.constant dense<0.000000e+00> : vector<1xf32>
      %244 = vector.multi_reduction <add>, %241, %cst_84 [1] : vector<1x32xf32> to vector<1xf32>
      %245 = vector.shape_cast %244 : vector<1xf32> to vector<1x1xf32>
      %cst_85 = arith.constant 3.200000e+01 : f32
      %246 = vector.broadcast %cst_85 : f32 to vector<1x1xf32>
      %247 = arith.divf %245, %246 : vector<1x1xf32>
      %248 = vector.broadcast %247 : vector<1x1xf32> to vector<1x32xf32>
      %249 = arith.subf %241, %248 : vector<1x32xf32>
      %250 = arith.mulf %249, %249 : vector<1x32xf32>
      %cst_86 = arith.constant dense<0.000000e+00> : vector<1xf32>
      %251 = vector.multi_reduction <add>, %250, %cst_86 [1] : vector<1x32xf32> to vector<1xf32>
      %252 = vector.shape_cast %251 : vector<1xf32> to vector<1x1xf32>
      %cst_87 = arith.constant 3.200000e+01 : f32
      %253 = vector.broadcast %cst_87 : f32 to vector<1x1xf32>
      %254 = arith.divf %252, %253 : vector<1x1xf32>
      %255 = vector.broadcast %247 : vector<1x1xf32> to vector<1x32xf32>
      %256 = arith.subf %241, %255 : vector<1x32xf32>
      %cst_88 = arith.constant 9.99999997E-7 : f32
      %257 = vector.broadcast %cst_88 : f32 to vector<1x1xf32>
      %258 = arith.addf %254, %257 : vector<1x1xf32>
      %259 = math.rsqrt %258 : vector<1x1xf32>
      %260 = vector.broadcast %259 : vector<1x1xf32> to vector<1x32xf32>
      %261 = arith.mulf %256, %260 : vector<1x32xf32>
      %262 = arith.mulf %261, %242 : vector<1x32xf32>
      %263 = arith.addf %262, %243 : vector<1x32xf32>
      %264 = arith.truncf %263 : vector<1x32xf32> to vector<1x32xbf16>
      %c0_89 = arith.constant 0 : index
      %c0_90 = arith.constant 0 : index
      %265 = vector.load %arg19[%c0_89, %c0_90] : memref<32x11xbf16, #tpu.memory_space<vmem>>, vector<32x11xbf16>
      %cst_91 = arith.constant dense<0.000000e+00> : vector<1x11xf32>
      %266 = tpu.matmul %264, %265, %cst_91 {dimension_numbers = #tpu.dot_dimension_numbers<[1], [0], [0], [1], [0, 0, 1, 1], [], []>} : vector<1x32xbf16>, vector<32x11xbf16>, vector<1x11xf32> -> vector<1x11xf32>
      %c0_92 = arith.constant 0 : index
      %c0_93 = arith.constant 0 : index
      %267 = vector.load %arg20[%c0_92, %c0_93] : memref<1x11xf32, #tpu.memory_space<vmem>>, vector<1x11xf32>
      %268 = arith.addf %266, %267 : vector<1x11xf32>
      %c0_94 = arith.constant 0 : index
      %c0_95 = arith.constant 0 : index
      %c0_96 = arith.constant 0 : index
      %269 = vector.load %arg21[%c0_94, %c0_95, %c0_96] : memref<1x1x11xf32, #tpu.memory_space<vmem>>, vector<1x1x11xf32>
      %270 = vector.shape_cast %269 : vector<1x1x11xf32> to vector<1x11xf32>
      %271 = vector.shape_cast %268 : vector<1x11xf32> to vector<1x1x11xf32>
      tpu.vector_store %arg21[%c0_94, %c0_95, %c0_96], %271 {strides = array<i32>} : memref<1x1x11xf32, #tpu.memory_space<vmem>>, vector<1x1x11xf32>,
    } else {
    }
    return
  }
  func.func @transform_0(%arg0: i32, %arg1: i32) -> (i32, i32, i32) {
    %c0_i32 = arith.constant 0 : i32
    %0 = arith.cmpi eq, %arg0, %c0_i32 : i32
    %c0_i32_0 = arith.constant 0 : i32
    %1 = arith.select %0, %arg1, %c0_i32_0 : i32
    %c0_i32_1 = arith.constant 0 : i32
    %c0_i32_2 = arith.constant 0 : i32
    %c0_i32_3 = arith.constant 0 : i32
    return %1, %c0_i32_1, %c0_i32_2 : i32, i32, i32
  }
  func.func @transform_1(%arg0: i32, %arg1: i32) -> (i32, i32, i32) {
    %c0_i32 = arith.constant 0 : i32
    %c0_i32_0 = arith.constant 0 : i32
    %c0_i32_1 = arith.constant 0 : i32
    return %arg1, %c0_i32, %c0_i32_0 : i32, i32, i32
  }
  func.func @transform_2(%arg0: i32, %arg1: i32) -> (i32, i32, i32) {
    %c0_i32 = arith.constant 0 : i32
    %c0_i32_0 = arith.constant 0 : i32
    %c0_i32_1 = arith.constant 0 : i32
    %c0_i32_2 = arith.constant 0 : i32
    return %c0_i32, %c0_i32_0, %c0_i32_1 : i32, i32, i32
  }
  func.func @transform_3(%arg0: i32, %arg1: i32) -> (i32, i32, i32) {
    %c0_i32 = arith.constant 0 : i32
    %c0_i32_0 = arith.constant 0 : i32
    %c0_i32_1 = arith.constant 0 : i32
    return %arg0, %c0_i32, %c0_i32_0 : i32, i32, i32
  }
  func.func @transform_4(%arg0: i32, %arg1: i32) -> (i32, i32, i32) {
    %c0_i32 = arith.constant 0 : i32
    %c0_i32_0 = arith.constant 0 : i32
    %c0_i32_1 = arith.constant 0 : i32
    return %arg0, %c0_i32, %c0_i32_0 : i32, i32, i32
  }
  func.func @transform_5(%arg0: i32, %arg1: i32) -> (i32, i32, i32) {
    %c0_i32 = arith.constant 0 : i32
    %c0_i32_0 = arith.constant 0 : i32
    %c0_i32_1 = arith.constant 0 : i32
    return %arg0, %c0_i32, %c0_i32_0 : i32, i32, i32
  }
  func.func @transform_6(%arg0: i32, %arg1: i32) -> (i32, i32, i32) {
    %c0_i32 = arith.constant 0 : i32
    %c0_i32_0 = arith.constant 0 : i32
    %c0_i32_1 = arith.constant 0 : i32
    return %arg0, %c0_i32, %c0_i32_0 : i32, i32, i32
  }
  func.func @transform_7(%arg0: i32, %arg1: i32) -> (i32, i32) {
    %c0_i32 = arith.constant 0 : i32
    %c0_i32_0 = arith.constant 0 : i32
    %c0_i32_1 = arith.constant 0 : i32
    return %c0_i32, %c0_i32_0 : i32, i32
  }
  func.func @transform_8(%arg0: i32, %arg1: i32) -> (i32, i32) {
    %c0_i32 = arith.constant 0 : i32
    %c0_i32_0 = arith.constant 0 : i32
    %c0_i32_1 = arith.constant 0 : i32
    return %c0_i32, %c0_i32_0 : i32, i32
  }
  func.func @transform_9(%arg0: i32, %arg1: i32) -> (i32, i32, i32) {
    %c0_i32 = arith.constant 0 : i32
    %c0_i32_0 = arith.constant 0 : i32
    %c0_i32_1 = arith.constant 0 : i32
    return %arg0, %c0_i32, %c0_i32_0 : i32, i32, i32
  }
  func.func @transform_10(%arg0: i32, %arg1: i32) -> (i32, i32, i32) {
    %c0_i32 = arith.constant 0 : i32
    %c0_i32_0 = arith.constant 0 : i32
    %c0_i32_1 = arith.constant 0 : i32
    return %arg0, %c0_i32, %c0_i32_0 : i32, i32, i32
  }
  func.func @transform_11(%arg0: i32, %arg1: i32) -> (i32, i32, i32) {
    %c0_i32 = arith.constant 0 : i32
    %c0_i32_0 = arith.constant 0 : i32
    %c0_i32_1 = arith.constant 0 : i32
    return %arg0, %c0_i32, %c0_i32_0 : i32, i32, i32
  }
  func.func @transform_12(%arg0: i32, %arg1: i32) -> (i32, i32, i32) {
    %c0_i32 = arith.constant 0 : i32
    %c0_i32_0 = arith.constant 0 : i32
    %c0_i32_1 = arith.constant 0 : i32
    return %arg0, %c0_i32, %c0_i32_0 : i32, i32, i32
  }
  func.func @transform_13(%arg0: i32, %arg1: i32) -> (i32, i32, i32) {
    %c0_i32 = arith.constant 0 : i32
    %c0_i32_0 = arith.constant 0 : i32
    %c0_i32_1 = arith.constant 0 : i32
    return %arg0, %c0_i32, %c0_i32_0 : i32, i32, i32
  }
  func.func @transform_14(%arg0: i32, %arg1: i32) -> (i32, i32, i32) {
    %c0_i32 = arith.constant 0 : i32
    %c0_i32_0 = arith.constant 0 : i32
    %c0_i32_1 = arith.constant 0 : i32
    return %arg0, %c0_i32, %c0_i32_0 : i32, i32, i32
  }
  func.func @transform_15(%arg0: i32, %arg1: i32) -> (i32, i32) {
    %c0_i32 = arith.constant 0 : i32
    %c0_i32_0 = arith.constant 0 : i32
    %c0_i32_1 = arith.constant 0 : i32
    return %c0_i32, %c0_i32_0 : i32, i32
  }
  func.func @transform_16(%arg0: i32, %arg1: i32) -> (i32, i32) {
    %c0_i32 = arith.constant 0 : i32
    %c0_i32_0 = arith.constant 0 : i32
    %c0_i32_1 = arith.constant 0 : i32
    return %c0_i32, %c0_i32_0 : i32, i32
  }
  func.func @transform_17(%arg0: i32, %arg1: i32) -> (i32, i32) {
    %c0_i32 = arith.constant 0 : i32
    %c0_i32_0 = arith.constant 0 : i32
    %c0_i32_1 = arith.constant 0 : i32
    return %c0_i32, %c0_i32_0 : i32, i32
  }
  func.func @transform_18(%arg0: i32, %arg1: i32) -> (i32, i32) {
    %c0_i32 = arith.constant 0 : i32
    %c0_i32_0 = arith.constant 0 : i32
    %c0_i32_1 = arith.constant 0 : i32
    return %c0_i32, %c0_i32_0 : i32, i32
  }
  func.func @transform_19(%arg0: i32, %arg1: i32) -> (i32, i32, i32) {
    %c0_i32 = arith.constant 0 : i32
    %c0_i32_0 = arith.constant 0 : i32
    %c0_i32_1 = arith.constant 0 : i32
    return %arg1, %c0_i32, %c0_i32_0 : i32, i32, i32
  }
}

</mosaic_0001>

<bundles_post_ra>
// kernel: tpu_custom_call.1
= control target key start
LH: loop header
LB: loop body
LE: loop exit
PB: predicated region body
PF: predicated region fallthrough
CT: control target
= control target key end

     0   :  { %s2652_s0 = inlined_call_operand.vmem [shape: f32[2,8,32], index: 0, kind: input, shape index: {}]   ;;  %s2653_s1 = inlined_call_operand.vmem [shape: f32[2,1,8], index: 1, kind: input, shape index: {}]   ;;  %s2654_s2 = inlined_call_operand.vmem [shape: f32[5,8,8], index: 2, kind: input, shape index: {}]   ;;  %s2655_s3 = inlined_call_operand.vmem [shape: f32[2,1,32], index: 3, kind: input, shape index: {}]   ;;  %s2656_s4 = inlined_call_operand.vmem [shape: f32[2,1,32], index: 4, kind: input, shape index: {}]   ;;  %s2657_s5 = inlined_call_operand.vmem [shape: bf16[2,32,96], index: 5, kind: input, shape index: {}]   ;;  %s2658_s6 = inlined_call_operand.vmem [shape: f32[2,1,96], index: 6, kind: input, shape index: {}]   ;;  %s2659_s7 = inlined_call_operand.vmem [shape: bf16[8,7], index: 7, kind: input, shape index: {}]   ;;  %s2660_s8 = inlined_call_operand.vmem [shape: f32[1,7], index: 8, kind: input, shape index: {}]   ;;  %s2661_s9 = inlined_call_operand.vmem [shape: f32[2,1,32], index: 9, kind: input, shape index: {}]   ;;  %s2662_s10 = inlined_call_operand.vmem [shape: f32[2,1,32], index: 10, kind: input, shape index: {}]   ;;  %s2663_s11 = inlined_call_operand.vmem [shape: bf16[2,32,128], index: 11, kind: input, shape index: {}]   ;;  %s2664_s12 = inlined_call_operand.vmem [shape: f32[2,1,128], index: 12, kind: input, shape index: {}]   ;;  %s2665_s13 = inlined_call_operand.vmem [shape: bf16[2,128,32], index: 13, kind: input, shape index: {}]   ;;  %s2666_s14 = inlined_call_operand.vmem [shape: f32[2,1,32], index: 14, kind: input, shape index: {}]   ;;  %s2667_s15 = inlined_call_operand.vmem [shape: f32[1,32], index: 15, kind: input, shape index: {}]   ;;  %s2668_s16 = inlined_call_operand.vmem [shape: f32[1,32], index: 16, kind: input, shape index: {}]   ;;  %s2669_s17 = inlined_call_operand.vmem [shape: bf16[32,11], index: 17, kind: input, shape index: {}]   ;;  %s2670_s18 = inlined_call_operand.vmem [shape: f32[1,11], index: 18, kind: input, shape index: {}]   ;;  %s2671_s19 = inlined_call_operand.hbm [shape: f32[2,1,11], index: 19, kind: output, shape index: {}]  }
   0x1   :  { %2687 = sst [smem:[#allocation18_spill]] %s2652_s0 }
   0x2   :  { %2688 = sst [smem:[#allocation19_spill]] %s2653_s1 }
   0x3   :  { %2689 = sst [smem:[#allocation20_spill]] %s2654_s2 }
   0x4   :  { %2690 = sst [smem:[#allocation21_spill]] %s2655_s3 }
   0x5   :  { %2691 = sst [smem:[#allocation22_spill]] %s2659_s7 }
   0x6   :  { %2692 = sst [smem:[#allocation23_spill]] %s2660_s8 }
   0x7   :  { %2693 = sst [smem:[#allocation24_spill]] %s2667_s15 }
   0x8   :  { %2694 = sst [smem:[#allocation25_spill]] %s2668_s16 }
   0x9   :  { %2695 = sst [smem:[#allocation26_spill]] %s2669_s17 }
   0xa   :  { %2696 = sst [smem:[#allocation27_spill]] %s2670_s18 }
   0xb   :  { %2697 = sst [smem:[#allocation28_spill]] %s2671_s19 }
   0xc   :  { %24 = vsyncpa [#allocation4], 0 }
   0xd   :  { %26 = vsyncpa [#allocation4 + $0x1], 0  ;;  %s2289_s0 = smov 0   ;;  %s2291_s30 = smov 0  }
   0xe   :  { %s2293_s20 = smov 0   ;;  %s2295_s21 = smov 0  }
   0xf   :  { %s2297_s1 = smov 0   ;;  %s2299_s22 = smov 0  }
  0x10   :  { %s2301_s2 = smov 0   ;;  %s2303_s23 = smov 0  }
  0x11 LB: > { %2698 = sst [smem:[#allocation6_spill]] %s2144_s0  ;;  %s1830_s24 = sadd.s32 4294967295, %s2172_s23   ;;  %s2172_s23 = sphi %s2303_s23, %s32_s23   ;;  %s2168_s2 = sphi %s2301_s2, %s2749_s2   ;;  %s2164_s22 = sphi %s2299_s22, %s2744_s22   ;;  %s2160_s1 = sphi %s2297_s1, %s2743_s1   ;;  %s2156_s21 = sphi %s2295_s21, %s2748_s21   ;;  %s2152_s20 = sphi %s2293_s20, %s2741_s20   ;;  %s2148_s30 = sphi %s2291_s30, %s2747_s30   ;;  %s2144_s0 = sphi %s2289_s0, %s2746_s0  }
  0x12   : > { %2699 = sst [smem:[#allocation7_spill]] %s2152_s20  ;;  %s1831_s25 = sadd.s32 4294967294, %s2172_s23  }
  0x13   : > { %2700 = sst [smem:[#allocation8_spill]] %s2156_s21  ;;  %s41_s3 = sadd.s32 1, %s2164_s22 }
  0x14   : > { %2701 = sst [smem:[#allocation9_spill]] %s2164_s22  ;;  %s44_s26 = sadd.s32 1, %s2168_s2 }
  0x15   : > { %2702 = sst [smem:[#allocation10_spill]] %s2168_s2  ;;  %p42_p0 = scmp.ge.s32.totalorder %s41_s3, 2 }
  0x16   : > { %2703 = sst [smem:[#allocation11_spill]] %s2172_s23  ;;  %s514_s27 = sadd.s32 1, %s2152_s20 }
  0x17   : > { %p524_p1 = scmp.ne.s32.totalorder %s2152_s20, %s2148_s30  ;;  %p525_p2 = scmp.eq.s32.totalorder %s1830_s24, 3 }
  0x18   : > { %s2751_s3 = smov (%p42_p0, %s41_s3), 0  ;;  %s2753_s26 = smov (!%p42_p0, %s44_s26), %s2168_s2 }
  0x19   : > { %2704 = sst [smem:[#allocation12_spill]] %s2751_s3  ;;  %s511_s28 = ssub.s32 %s2164_s22, %s2751_s3 }
  0x1a   : > { %p2341_p3 = por %p525_p2, %p524_p1  ;;  %p46_p4 = scmp.ge.s32.totalorder %s2753_s26, 2 }
  0x1b   : > { %p512_p5 = scmp.eq.s32.totalorder %s511_s28, 0  ;;  %p530_p6 = scmp.ne.s32.totalorder %s2148_s30, %s2144_s0 }
  0x1c   : > { %s2705_s29 = scalar_select %p2341_p3, 1, 0 }
  0x1d   : > { %p531_p7 = scmp.eq.s32.totalorder %s1831_s25, 3  ;;  %s2755_s26 = smov (%p46_p4, %s2753_s26), 0 }
  0x1e   : > { %2706 = sst [smem:[#allocation13_spill]] %s2705_s29  ;;  %p1834_p9 = scmp.ge.s32.totalorder %s2172_s23, 1 }
  0x1f   : > { %2707 = sst [smem:[#allocation14_spill]] %s2755_s26  ;;  %p2352_p8 = por %p531_p7, %p530_p6 }
  0x20   : > { %s2350_s19 = scalar_select %p512_p5, %s2152_s20, %s514_s27  }
  0x21   : > { %s2709_s18 = scalar_select %p2352_p8, 1, 0 }
  0x22   : > { %2708 = sst [smem:[#allocation15_spill]] %s2350_s19  ;;  %p653_p10 = scmp.lt.s32.totalorder %s2172_s23, 5 }
  0x23   : > { %2710 = sst [smem:[#allocation16_spill]] %s2709_s18 }
  0x24   : > { %p654_p11 = pnand %p1834_p9, %p653_p10 }
  0x26   : > { %657 = sbr.rel (%p654_p11) target bundleno = 2430 (0x97e), region = 96 }
  0x2b   : > { %p748_p12 = scmp.eq.s32.totalorder %s2160_s1, 0  ;;  %p756_p13 = scmp.lt.s32.totalorder %s2156_s21, 1 }
  0x2c   : > { %p759_p1 = scmp.lt.s32.totalorder %s2160_s1, 1  ;;  %s2713_s18 = sld [smem:[#allocation18_spill]] }
  0x2d   : > { %s749_s25 = scalar_select %p748_p12, %s2156_s21, 0 }
  0x2e   : > { %s2363_s27 = scalar_select %p756_p13, %s2156_s21, 1 }
  0x2f   : > { %p750_p0 = scmp.lt.s32.totalorder %s749_s25, 1  ;;  %p1842_p2 = scmp.ne.s32.totalorder %s2160_s1, 0 }
  0x30   : > { %2711 = sst [smem:[#allocation17_spill]] %s2363_s27 }
  0x31   : > { %s2757_s25 = smov (!%p750_p0, %s749_s25), 1 }
  0x32   : > { %s2371_s22 = scalar_select %p759_p1, %s2160_s1, 1 }
  0x33   : > { %s1835_s24 = sshll.u32 %s2757_s25, 3 }
  0x34   : > { %s753_s0 = scalar_lea.vmem %s2713_s18, %s1835_s24  ;;  %s1917_s15 = sshll.u32 %s2371_s22, 4 }
  0x35   : > { %s2388_s8 = scalar_lea.vmem %s2657_s5, %s1917_s15  ;;  %s778_s3 = scalar_lea.vmem %s2662_s10, %s2371_s22 }
  0x36   : > { %s2405_s28 = scalar_lea.vmem %s2663_s11, %s1917_s15  ;;  %s786_s16 = scalar_lea.vmem %s2664_s12, %s2371_s22 }
  0x37   : > { %s1919_s2 = sshll.u32 %s2371_s22, 6  ;;  %s794_s21 = scalar_lea.vmem %s2666_s14, %s2371_s22 }
  0x38   : > { %s2419_s20 = scalar_lea.vmem %s2665_s13, %s1919_s2  ;;  %s2715_s24 = sand.u32 1, %s2148_s30  }
  0x39   : > { %s2423_s26 = scalar_lea.vmem [#allocation3], %s2715_s24  ;;  %799 = sbr.rel (%p1842_p2) target bundleno = 67 (0x43), region = 100 }
  0x3a   : > { %s2716_s15 = sld [smem:[#allocation8_spill]] (!%p1842_p2) }
  0x3e   : > { %v800_v0 = vld [vmem:[%s753_s0] sm:$0xff]  ;;  %vm803_vm0 = vcmask 261120  }
  0x40   : > { %s1843_s23 = sshll.u32 %s2716_s15, 3 }
  0x41   : > { %s802_s29 = scalar_lea.vmem [#allocation2], %s1843_s23 }
  0x42   : > { %804 = vst.msk [vmem:[%s802_s29] sm:$0xff] %vm803_vm0, %v800_v0 }
  0x43 PF: > { %s2717_s17 = sld [smem:[#allocation8_spill]]  ;;  %vm811_vm1 = vcmask 261120   ;;  %v2174_v3 = vmov 32.0   ;;  %v1921_v15 = vld [vmem:[%s2388_s8 + $0x8] sm:$0xff]  ;;  %v1920_v16 = vld [vmem:[%s2388_s8] sm:$0xff]  ;;  %s2720_s24 = scalar_lea.vmem %s2656_s4, %s2371_s22  ;;  %vm922_vm6 = vcmask 1043456  }
  0x44   : > { %2050 = vrcp.f32 %v2174_v3  ;;  %879 = vmatpush.bf16.msra.mxu0 %v1921_v15  ;;  %s2718_s8 = sld [smem:[#allocation21_spill]]  ;;  %v2042_v29 = vld [vmem:[%s2720_s24] ss:$0 sm:$0xff]  ;;  %s2722_s0 = scalar_lea.vmem %s2658_s6, %s2371_s22  ;;  %vm915_vm7 = vcmask 64512   ;;  %v2179_v60 = vmov 2   ;;  %v2182_v15 = vmov 3  }
  0x45   : > { %s2721_s29 = sld [smem:[#allocation22_spill]]  ;;  %v2043_v35 = vld [vmem:[%s2722_s0] ss:$0 sm:$0xff]  ;;  %s2175_s2 = smov 120   ;;  %2025 = vset.pattern.permute.xlu2 %v2179_v60 }
  0x46   : > { %s2178_s19 = smov 96   ;;  %s2723_s15 = sld [smem:[#allocation23_spill]] }
  0x47   : > { %s2724_s23 = sld [smem:[#allocation17_spill]]  ;;  %s2728_s24 = scalar_lea.vmem %s2661_s9, %s2371_s22 }
  0x48   : > { %880 = vmatpush.bf16.msra.mxu0 %v1920_v16  ;;  %p1905_p4 = scmp.ne.s32.totalorder %s2160_s1, 1 }
  0x49   : > { %s1844_s27 = sshll.u32 %s2717_s17, 3  ;;  %s2731_s18 = sld [smem:[#allocation25_spill]] (!%p1905_p4) }
  0x4a   : > { %s2428_s7 = scalar_lea.vmem [#allocation2], %s1844_s27  ;;  %v2051_v4 = vpop.eup %2050  ;;  %s2719_s25 = scalar_lea.vmem %s2718_s8, %s2371_s22 }
  0x4b   : > { %v2431_v1 = vld [vmem:[%s2428_s7] sm:$0xff]  ;;  %v816_v5 = vmul.f32 32.0, %v2051_v4  ;;  %vm820_vm2 = vweird.f32 %v2051_v4  ;;  %s2176_s8 = smov 104   ;;  %s2725_s27 = sld [smem:[#allocation20_spill]] }
  0x4c   : > { %v812_v2 = vsel %vm811_vm1, %v2431_v1, 0.0  ;;  %v2041_v26 = vld [vmem:[%s2719_s25] ss:$0 sm:$0xff]  ;;  %s2177_s25 = smov 112  }
  0x4d   : > { %813 = vadd.xlane.f32.xlu0 %v812_v2  ;;  %v817_v6 = vsub.f32 1.0, %v816_v5  ;;  %v910_v33 = vld [vmem:[%s2721_s29] sm:$0xf] }
  0x4e   : > { %v924_v34 = vsel %vm922_vm6, %v910_v33, 0 }
  0x4f   : > { %v818_v7 = vmul.f32 %v2051_v4, %v817_v6  ;;  %933 = vmatpush.bf16.msra.mxu1 %v924_v34  ;;  %1934 = vmatpush.bf16.msra.mxu2 %v924_v34  ;;  %v2044_v6 = vld [vmem:[%s2723_s15] ss:$0 sm:$0xff]  ;;  %s2732_s15 = sld [smem:[#allocation27_spill]] (!%p1905_p4) }
  0x51   : > { %v819_v8 = vadd.f32 %v2051_v4, %v818_v7 }
  0x53   : > { %v2435_v9 = vsel %vm820_vm2, %v2051_v4, %v819_v8 }
  0xc0   : > { %v814_v10 = vpop.xlane.xlu0 %813 }
  0xc1   : > { %v822_v11 = vmul.f32 %v2435_v9, %v814_v10  ;;  %v2180_v10 = vmov 1  }
  0xc2   : > { %2022 = vset.pattern.permute.xlu1 %v2180_v10 }
  0xc3   : > { %v823_v12 = vsub.f32 %v2431_v1, %v822_v11  ;;  %v2181_v11 = vmov 0  }
  0xc4   : > { %2021 = vset.pattern.permute.xlu0 %v2181_v11 }
  0xc5   : > { %v824_v13 = vmul.f32 %v823_v12, %v823_v12 }
  0xc7   : > { %v825_v14 = vsel %vm811_vm1, %v824_v13, 0.0 }
  0xc8   : > { %826 = vadd.xlane.f32.xlu0 %v825_v14 }
 0x13b   : > { %v827_v17 = vpop.xlane.xlu0 %826 }
 0x13c   : > { %v828_v18 = vmul.f32 %v827_v17, %v2435_v9 }
 0x13e   : > { %v829_v19 = vadd.f32 1e-06, %v828_v18 }
 0x140   : > { %2052 = vrsqrt.f32 %v829_v19  ;;  %vm836_vm4 = vweird.f32 %v829_v19 }
 0x146   : > { %v2053_v20 = vpop.eup %2052 }
 0x147   : > { %v831_v21 = vmul.f32 %v2053_v20, %v829_v19  ;;  %vm837_vm3 = vweird.f32 %v2053_v20 }
 0x148   : > { %vm838_vm5 = vmor %vm836_vm4, %vm837_vm3 }
 0x149   : > { %v832_v22 = vmul.f32 %v2053_v20, %v831_v21 }
 0x14b   : > { %v833_v23 = vmul.f32 0.5, %v832_v22  ;;  %v2183_v22 = vmov 4  }
 0x14d   : > { %v834_v24 = vsub.f32 1.5, %v833_v23 }
 0x14f   : > { %v835_v25 = vmul.f32 %v2053_v20, %v834_v24 }
 0x151   : > { %v839_v27 = vsel %vm838_vm5, %v2053_v20, %v835_v25 }
 0x152   : > { %v840_v28 = vmul.f32 %v839_v27, %v823_v12 }
 0x154   : > { %v844_v30 = vmul.f32 %v2041_v26, %v840_v28 }
 0x156   : > { %v848_v31 = vadd.f32 %v2042_v29, %v844_v30 }
 0x158   : > { %v849_v32 = vpack.c.bf16 %v848_v31, %v848_v31 }
 0x15a   : > { %1853 = vmatmul.msk.bf16.vlgmr.msra.gmra.mxu0 %vm811_vm1, %v849_v32 }
 0x1d7   : > { %v882_v36 = vpop.f32.mrf.mxu0 }
 0x1d8   : > { %v883_v37 = vadd.f32 %v2043_v35, %v882_v36 }
 0x1da   : > { %887 = vrot.lane.b32.xlu2 %v883_v37, %s2175_s2  ;;  %893 = vrot.lane.b32.xlu1 %v883_v37, %s2176_s8  ;;  %v904_v38 = vpack.c.bf16 %v883_v37, %v883_v37  ;;  %v896_v58 = vmul.f32 0.35355338, %v883_v37  ;;  %s2726_s8 = sld [smem:[#allocation19_spill]]  ;;  %s2184_s2 = smov 64  }
 0x1dc   : > { %v949_v39 = vunpack.c.l.b16 %v904_v38  ;;  %v900_v59 = vpack.c.bf16 %v896_v58, %v896_v58 }
 0x1de   : > { %v2463_v41 = vpack.c.b16 %v949_v39, %v949_v39 }
 0x1df   : > { %v884_v40 = vpop.f32.mrf.mxu0 }
 0x1e0   : > { %v1044_v40 = vld [vmem:[%s2725_s27] sm:$0xff] }
 0x1e2   : > { %890 = vrot.lane.b32.xlu1 %v883_v37, %s2177_s25  ;;  %951 = vrot.lane.b32.xlu2 %v2463_v41, %s2178_s19  ;;  %s2727_s25 = scalar_lea.vmem %s2726_s8, %s2724_s23  ;;  %s2185_s8 = smov 8  }
 0x234   : > { %v888_v42 = vpop.permute.xlu2 %887 }
 0x235   : > { %v905_v43 = vpack.c.bf16 %v888_v42, %v888_v42  ;;  %v908_v44 = vpack.c.bf16 %v888_v42, %v883_v37  ;;  %v897_v63 = vmul.f32 0.35355338, %v888_v42  ;;  %v2045_v42 = vld [vmem:[%s2727_s25] ss:$0 sm:$0xff]  ;;  %s2186_s25 = smov 16  }
 0x237   : > { %v973_v45 = vunpack.c.l.b16 %v905_v43  ;;  %1854 = vmatmul.msk.bf16.vlgmr.msra.gmra.mxu1 %vm915_vm7, %v908_v44  ;;  %v901_v2 = vpack.c.bf16 %v897_v63, %v897_v63 }
 0x239   : > { %v2467_v46 = vpack.c.b16 %v973_v45, %v973_v45  ;;  %v1046_v45 = vld [vmem:[%s2725_s27 + $0x10] sm:$0xff] }
 0x23b   : > { %975 = vrot.lane.b32.xlu1 %v2467_v46, %s2178_s19 }
 0x23c   : > { %v952_v47 = vpop.permute.xlu2 %951 }
 0x23d   : > { %v957_v48 = vsel %vm915_vm7, %v952_v47, 0  ;;  %v1045_v47 = vld [vmem:[%s2725_s27 + $0x8] sm:$0xff] }
 0x23e   : > { %966 = vmatpush.bf16.xpose.msrb.mxu2 %v957_v48 }
 0x24c   : > { %v894_v49 = vpop.permute.xlu1 %893 }
 0x24d   : > { %v907_v50 = vpack.c.bf16 %v894_v49, %v894_v49  ;;  %v899_v16 = vmul.f32 0.35355338, %v894_v49 }
 0x24f   : > { %v1021_v51 = vunpack.c.l.b16 %v907_v50  ;;  %v903_v17 = vpack.c.bf16 %v899_v16, %v899_v16 }
 0x251   : > { %v2471_v52 = vpack.c.b16 %v1021_v51, %v1021_v51  ;;  %v1047_v51 = vld [vmem:[%s2725_s27 + $0x18] sm:$0xff] }
 0x253   : > { %1023 = vrot.lane.b32.xlu0 %v2471_v52, %s2178_s19 }
 0x254   : > { %v891_v53 = vpop.permute.xlu1 %890 }
 0x255   : > { %v906_v54 = vpack.c.bf16 %v891_v53, %v891_v53  ;;  %v909_v55 = vpack.c.bf16 %v894_v49, %v891_v53  ;;  %v898_v5 = vmul.f32 0.35355338, %v891_v53 }
 0x257   : > { %v997_v56 = vunpack.c.l.b16 %v906_v54  ;;  %1855 = vmatmul.msk.bf16.vlgmr.msra.gmra.mxu2 %vm915_vm7, %v909_v55  ;;  %v902_v7 = vpack.c.bf16 %v898_v5, %v898_v5 }
 0x259   : > { %v2475_v57 = vpack.c.b16 %v997_v56, %v997_v56 }
 0x25b   : > { %999 = vrot.lane.b32.xlu2 %v2475_v57, %s2178_s19  ;;  %s2187_s19 = smov 24  }
 0x267   : > { %1856 = vmatmul.msk.bf16.vlgmr.msrb.gmra.mxu2 %vm915_vm7, %v900_v59 }
 0x2ad   : > { %v976_v61 = vpop.permute.xlu1 %975 }
 0x2ae   : > { %v981_v62 = vsel %vm915_vm7, %v976_v61, 0 }
 0x2af   : > { %990 = vmatpush.bf16.xpose.msra.mxu3 %v981_v62 }
 0x2b4   : > { %v935_v0 = vpop.f32.mrf.mxu1 }
 0x2b5   : > { %v1000_v3 = vpop.permute.xlu2 %999  ;;  %v936_v25 = vadd.f32 %v2044_v6, %v935_v0 }
 0x2b6   : > { %1857 = vmatmul.msk.bf16.vlgmr.msra.gmra.mxu3 %vm915_vm7, %v901_v2  ;;  %v1005_v4 = vsel %vm915_vm7, %v1000_v3, 0 }
 0x2b7   : > { %1014 = vmatpush.bf16.xpose.msrb.mxu0 %v1005_v4 }
 0x2bc   : > { %v937_v8 = vpop.f32.mrf.mxu1 }
 0x2bd   : > { %v938_v12 = vadd.f32 %v2044_v6, %v937_v8 }
 0x2be   : > { %1858 = vmatmul.msk.bf16.vlgmr.msrb.gmra.mxu0 %vm915_vm7, %v902_v7 }
 0x2bf   : > { %1106 = vperm.xlu2 %2025, %v938_v12  }
 0x2c5   : > { %v1024_v13 = vpop.permute.xlu0 %1023 }
 0x2c6   : > { %v1029_v14 = vsel %vm915_vm7, %v1024_v13, 0 }
 0x2c7   : > { %2028 = vset.pattern.permute.xlu2 %v2182_v15  ;;  %1038 = vmatpush.bf16.xpose.msra.mxu2 %v1029_v14 }
 0x2c8   : > { %1130 = vperm.xlu2 %2028, %v938_v12  }
 0x2ce   : > { %1859 = vmatmul.msk.bf16.vlgmr.msra.gmra.mxu2 %vm915_vm7, %v903_v17 }
 0x2d0   : > { %2030 = vset.pattern.permute.xlu2 %v2180_v10 }
 0x2da   : > { %v940_v18 = vpop.f32.mrf.mxu2 }
 0x2db   : > { %v941_v19 = vadd.f32 %v2044_v6, %v940_v18 }
 0x2dd   : > { %1086 = vperm.xlu1 %2022, %v941_v19   ;;  %1061 = vperm.xlu0 %2021, %v941_v19  }
 0x2e2   : > { %v942_v20 = vpop.f32.mrf.mxu2 }
 0x2e3   : > { %v943_v21 = vadd.f32 %v2044_v6, %v942_v20 }
 0x2e5   : > { %2023 = vset.pattern.permute.xlu1 %v2181_v11  ;;  %2034 = vset.pattern.permute.xlu0 %v2183_v22 }
 0x2e6   : > { %1090 = vperm.xlu2 %2030, %v943_v21   ;;  %1056 = vperm.xlu1 %2023, %v938_v12  }
 0x2e7   : > { %1158 = vperm.xlu0 %2034, %v941_v19  }
 0x2ea   : > { %v2488_v23 = vpop.f32.mrf.mxu2 }
 0x2ee   : > { %2031 = vset.pattern.permute.xlu2 %v2179_v60  ;;  %2024 = vset.pattern.permute.xlu1 %v2180_v10 }
 0x2ef   : > { %1162 = vperm.xlu0 %2034, %v943_v21   ;;  %1114 = vperm.xlu2 %2031, %v943_v21  }
 0x2f0   : > { %1082 = vperm.xlu1 %2024, %v938_v12  }
 0x2f2   : > { %v970_v24 = vpop.f32.mrf.mxu2 }
 0x2f7   : > { %2037 = vset.pattern.permute.xlu0 %v2179_v60  ;;  %2032 = vset.pattern.permute.xlu2 %v2182_v15 }
 0x2f8   : > { %2026 = vset.pattern.permute.xlu1 %v2181_v11  ;;  %1102 = vperm.xlu0 %2037, %v936_v25  }
 0x2f9   : > { %1138 = vperm.xlu2 %2032, %v943_v21   ;;  %1066 = vperm.xlu1 %2026, %v943_v21  }
 0x300   : > { %2040 = vset.pattern.permute.xlu0 %v2183_v22 }
 0x301   : > { %2033 = vset.pattern.permute.xlu2 %v2183_v22  ;;  %2027 = vset.pattern.permute.xlu1 %v2179_v60  ;;  %v1048_v60 = vld [vmem:[%s2725_s27 + $0x20] sm:$0xff] }
 0x302   : > { %1154 = vperm.xlu2 %2033, %v938_v12   ;;  %1110 = vperm.xlu1 %2027, %v941_v19  }
 0x30a   : > { %2036 = vset.pattern.permute.xlu2 %v2180_v10  ;;  %2029 = vset.pattern.permute.xlu1 %v2182_v15 }
 0x30b   : > { %1078 = vperm.xlu2 %2036, %v936_v25   ;;  %1134 = vperm.xlu1 %2029, %v941_v19  }
 0x313   : > { %2039 = vset.pattern.permute.xlu2 %v2183_v22  ;;  %2035 = vset.pattern.permute.xlu1 %v2181_v11 }
 0x314   : > { %1150 = vperm.xlu2 %2039, %v936_v25   ;;  %1051 = vperm.xlu1 %2035, %v936_v25  }
 0x319   : > { %v1107_v26 = vpop.permute.xlu2 %1106 }
 0x31a   : > { %v1118_v53 = vmul.f32 %v1107_v26, %v1046_v45 }
 0x31c   : > { %2038 = vset.pattern.permute.xlu1 %v2182_v15 }
 0x31d   : > { %1126 = vperm.xlu1 %2038, %v936_v25  }
 0x322   : > { %v1131_v29 = vpop.permute.xlu2 %1130 }
 0x323   : > { %v1142_v56 = vmul.f32 %v1131_v29, %v1047_v51 }
 0x339   : > { %v992_v27 = vpop.f32.mrf.mxu3 }
 0x33a   : > { %v993_v44 = vadd.f32 %v2045_v42, %v992_v27 }
 0x33b   : > { %v1016_v28 = vpop.f32.mrf.mxu0 }
 0x33c   : > { %v1017_v17 = vadd.f32 %v2045_v42, %v1016_v28  ;;  %v969_v28 = vadd.f32 %v2045_v42, %v2488_v23 }
 0x340   : > { %v1091_v32 = vpop.permute.xlu2 %1090 }
 0x341   : > { %v994_v30 = vpop.f32.mrf.mxu3  ;;  %v1096_v5 = vmul.f32 %v1091_v32, %v1045_v47 }
 0x343   : > { %v1018_v31 = vpop.f32.mrf.mxu0 }
 0x349   : > { %v1115_v35 = vpop.permute.xlu2 %1114 }
 0x34a   : > { %v1120_v7 = vmul.f32 %v1115_v35, %v1046_v45 }
 0x34f   : > { %v1087_v33 = vpop.permute.xlu1 %1086  ;;  %v1062_v39 = vpop.permute.xlu0 %1061 }
 0x350   : > { %v1071_v13 = vmul.f32 %v1062_v39, %v1044_v40  ;;  %v1095_v21 = vmul.f32 %v1087_v33, %v1045_v47 }
 0x351   : > { %v1040_v34 = vpop.f32.mrf.mxu2 }
 0x352   : > { %v1041_v2 = vadd.f32 %v2045_v42, %v1040_v34  ;;  %v1075_v19 = vadd.f32 %v1071_v13, %v1017_v17 }
 0x353   : > { %v1139_v38 = vpop.permute.xlu2 %1138 }
 0x354   : > { %v1144_v11 = vmul.f32 %v1139_v38, %v1047_v51  ;;  %v1099_v24 = vadd.f32 %v1095_v21, %v1075_v19 }
 0x358   : > { %v1057_v36 = vpop.permute.xlu1 %1056 }
 0x359   : > { %v1042_v37 = vpop.f32.mrf.mxu2  ;;  %v1070_v43 = vmul.f32 %v1057_v36, %v1044_v40  ;;  %v1159_v58 = vpop.permute.xlu0 %1158 }
 0x35a   : > { %v1167_v29 = vmul.f32 %v1159_v58, %v1048_v60 }
 0x35b   : > { %v1074_v49 = vadd.f32 %v1070_v43, %v993_v44 }
 0x35c   : > { %v1155_v55 = vpop.permute.xlu2 %1154 }
 0x35d   : > { %v1166_v61 = vmul.f32 %v1155_v55, %v1048_v60 }
 0x361   : > { %v1163_v10 = vpop.permute.xlu0 %1162 }
 0x362   : > { %v1083_v48 = vpop.permute.xlu1 %1082  ;;  %v1168_v14 = vmul.f32 %v1163_v10, %v1048_v60 }
 0x363   : > { %v1094_v50 = vmul.f32 %v1083_v48, %v1045_v47 }
 0x365   : > { %v1098_v54 = vadd.f32 %v1094_v50, %v1074_v49  ;;  %v1079_v34 = vpop.permute.xlu2 %1078 }
 0x366   : > { %v1093_v38 = vmul.f32 %v1079_v34, %v1045_v47 }
 0x367   : > { %v1122_v59 = vadd.f32 %v1118_v53, %v1098_v54 }
 0x369   : > { %v1146_v62 = vadd.f32 %v1142_v56, %v1122_v59 }
 0x36a   : > { %v1103_v39 = vpop.permute.xlu0 %1102 }
 0x36b   : > { %v1067_v63 = vpop.permute.xlu1 %1066  ;;  %v1170_v0 = vadd.f32 %v1166_v61, %v1146_v62  ;;  %v1117_v43 = vmul.f32 %v1103_v39, %v1046_v45 }
 0x36c   : > { %v1072_v3 = vmul.f32 %v1067_v63, %v1044_v40 }
 0x36d   : > { %v1176_v4 = vsel %vm915_vm7, %v1170_v0, -inf }
 0x36e   : > { %v1076_v6 = vadd.f32 %v1072_v3, %v1041_v2  ;;  %1177 = vmax.xlane.f32.xlu2 %v1176_v4  ;;  %v1151_v44 = vpop.permute.xlu2 %1150 }
 0x36f   : > { %v1165_v53 = vmul.f32 %v1151_v44, %v1048_v60 }
 0x370   : > { %v1100_v8 = vadd.f32 %v1096_v5, %v1076_v6 }
 0x372   : > { %v1124_v12 = vadd.f32 %v1120_v7, %v1100_v8 }
 0x374   : > { %v1111_v15 = vpop.permute.xlu1 %1110  ;;  %v1148_v16 = vadd.f32 %v1144_v11, %v1124_v12 }
 0x375   : > { %v1119_v22 = vmul.f32 %v1111_v15, %v1046_v45 }
 0x376   : > { %v1172_v18 = vadd.f32 %v1168_v14, %v1148_v16 }
 0x377   : > { %v1123_v26 = vadd.f32 %v1119_v22, %v1099_v24 }
 0x378   : > { %v1182_v20 = vsel %vm915_vm7, %v1172_v18, -inf }
 0x379   : > { %1183 = vmax.xlane.f32.xlu1 %v1182_v20 }
 0x37d   : > { %v1135_v25 = vpop.permute.xlu1 %1134 }
 0x37e   : > { %v1143_v27 = vmul.f32 %v1135_v25, %v1047_v51 }
 0x380   : > { %v1147_v30 = vadd.f32 %v1143_v27, %v1123_v26 }
 0x382   : > { %v1171_v31 = vadd.f32 %v1167_v29, %v1147_v30 }
 0x384   : > { %v1179_v32 = vsel %vm915_vm7, %v1171_v31, -inf }
 0x385   : > { %1180 = vmax.xlane.f32.xlu0 %v1179_v32 }
 0x386   : > { %v1052_v35 = vpop.permute.xlu1 %1051 }
 0x387   : > { %v1069_v36 = vmul.f32 %v1052_v35, %v1044_v40 }
 0x389   : > { %v1073_v37 = vadd.f32 %v1069_v36, %v969_v28 }
 0x38b   : > { %v1097_v33 = vadd.f32 %v1093_v38, %v1073_v37 }
 0x38d   : > { %v1121_v49 = vadd.f32 %v1117_v43, %v1097_v33 }
 0x38f   : > { %v1127_v48 = vpop.permute.xlu1 %1126 }
 0x390   : > { %v1141_v50 = vmul.f32 %v1127_v48, %v1047_v51 }
 0x392   : > { %v1145_v54 = vadd.f32 %v1141_v50, %v1121_v49 }
 0x394   : > { %v1169_v55 = vadd.f32 %v1165_v53, %v1145_v54 }
 0x396   : > { %v1173_v56 = vsel %vm915_vm7, %v1169_v55, -inf }
 0x397   : > { %1174 = vmax.xlane.f32.xlu2 %v1173_v56 }
 0x3e1   : > { %v1178_v58 = vpop.xlane.xlu2 %1177 }
 0x3e2   : > { %v1186_v59 = vsub.f32 %v1170_v0, %v1178_v58 }
 0x3e4   : > { %v1191_v61 = vmul.f32 1.442695, %v1186_v59 }
 0x3e6   : > { %2054 = vpow2.f32 %v1191_v61 }
 0x3ec   : > { %v2055_v23 = vpop.eup %2054  ;;  %v1184_v40 = vpop.xlane.xlu1 %1183 }
 0x3ed   : > { %v1188_v42 = vsub.f32 %v1172_v18, %v1184_v40  ;;  %v1200_v47 = vsel %vm915_vm7, %v2055_v23, 0.0 }
 0x3ee   : > { %1201 = vadd.xlane.f32.xlu0 %v1200_v47 }
 0x3ef   : > { %v1195_v45 = vmul.f32 1.442695, %v1188_v42 }
 0x3f1   : > { %2056 = vpow2.f32 %v1195_v45 }
 0x3f7   : > { %v2516_v62 = vpop.eup %2056 }
 0x3f8   : > { %v1181_v51 = vpop.xlane.xlu0 %1180  ;;  %v1206_v60 = vsel %vm915_vm7, %v2516_v62, 0.0 }
 0x3f9   : > { %v1187_v63 = vsub.f32 %v1171_v31, %v1181_v51  ;;  %1207 = vadd.xlane.f32.xlu1 %v1206_v60 }
 0x3fb   : > { %v1193_v2 = vmul.f32 1.442695, %v1187_v63 }
 0x3fd   : > { %2058 = vpow2.f32 %v1193_v2 }
 0x402   : > { %1298 = vrot.lane.b32.xlu0 %v2467_v46, %s2184_s2 }
 0x403   : > { %v2521_v0 = vpop.eup %2058 }
 0x404   : > { %v1203_v3 = vsel %vm915_vm7, %v2521_v0, 0.0 }
 0x405   : > { %1204 = vadd.xlane.f32.xlu2 %v1203_v3 }
 0x40a   : > { %v1175_v4 = vpop.xlane.xlu2 %1174 }
 0x40b   : > { %v1185_v5 = vsub.f32 %v1169_v55, %v1175_v4 }
 0x40d   : > { %v1189_v6 = vmul.f32 1.442695, %v1185_v5 }
 0x40f   : > { %2060 = vpow2.f32 %v1189_v6 }
 0x412   : > { %1340 = vrot.lane.b32.xlu1 %v2471_v52, %s2184_s2 }
 0x415   : > { %v2528_v7 = vpop.eup %2060 }
 0x416   : > { %v1197_v46 = vsel %vm915_vm7, %v2528_v7, 0.0 }
 0x41a   : > { %1277 = vrot.lane.b32.xlu1 %v2463_v41, %s2184_s2 }
 0x41d   : > { %1319 = vrot.lane.b32.xlu2 %v2475_v57, %s2184_s2 }
 0x42c   : > { %1198 = vadd.xlane.f32.xlu0 %v1197_v46 }
 0x461   : > { %v1202_v8 = vpop.xlane.xlu0 %1201 }
 0x462   : > { %2062 = vrcp.f32 %v1202_v8  ;;  %v1235_v52 = vand.u32 2147483648, %v1202_v8  ;;  %v1233_v41 = vand.u32 2147483647, %v1202_v8  ;;  %vm1229_vm9 = vweird.f32 %v1202_v8 }
 0x464   : > { %v1236_v15 = vor.u32 1.1754944e-38, %v1235_v52  ;;  %vm1234_vm11 = vcmp.eq.f32.partialorder %v1233_v41, 8.507059e+37 }
 0x468   : > { %v2063_v10 = vpop.eup %2062 }
 0x469   : > { %v1225_v11 = vmul.f32 %v2063_v10, %v1202_v8  ;;  %vm1230_vm8 = vweird.f32 %v2063_v10 }
 0x46a   : > { %vm1231_vm10 = vmor %vm1229_vm9, %vm1230_vm8 }
 0x46b   : > { %v1226_v12 = vsub.f32 1.0, %v1225_v11 }
 0x46c   : > { %v1208_v13 = vpop.xlane.xlu1 %1207 }
 0x46d   : > { %v1227_v14 = vmul.f32 %v2063_v10, %v1226_v12  ;;  %2064 = vrcp.f32 %v1208_v13  ;;  %v1265_v30 = vand.u32 2147483648, %v1208_v13  ;;  %vm1259_vm13 = vweird.f32 %v1208_v13 }
 0x46e   : > { %v1263_v31 = vand.u32 2147483647, %v1208_v13 }
 0x46f   : > { %v1228_v57 = vadd.f32 %v2063_v10, %v1227_v14  ;;  %v1266_v34 = vor.u32 1.1754944e-38, %v1265_v30 }
 0x470   : > { %vm1264_vm15 = vcmp.eq.f32.partialorder %v1263_v31, 8.507059e+37 }
 0x471   : > { %v1232_v16 = vsel %vm1231_vm10, %v2063_v10, %v1228_v57 }
 0x472   : > { %v1237_v17 = vsel %vm1234_vm11, %v1236_v15, %v1232_v16  ;;  %vm1376_vm11 = vcmask 195584  }
 0x473   : > { %v2065_v18 = vpop.eup %2064  ;;  %v1270_v19 = vmul.f32 %v2055_v23, %v1237_v17 }
 0x474   : > { %v1255_v20 = vmul.f32 %v2065_v18, %v1208_v13  ;;  %v1299_v21 = vpop.permute.xlu0 %1298  ;;  %vm1260_vm12 = vweird.f32 %v2065_v18 }
 0x475   : > { %v1304_v22 = vsel %vm922_vm6, %v1299_v21, 0  ;;  %v1274_v25 = vpack.c.bf16 %v1270_v19, %v1270_v19  ;;  %vm1261_vm14 = vmor %vm1259_vm13, %vm1260_vm12 }
 0x476   : > { %v1256_v24 = vsub.f32 1.0, %v1255_v20  ;;  %1313 = vmatpush.bf16.msrb.mxu1 %v1304_v22 }
 0x478   : > { %v1257_v26 = vmul.f32 %v2065_v18, %v1256_v24  ;;  %v1205_v27 = vpop.xlane.xlu2 %1204 }
 0x479   : > { %2066 = vrcp.f32 %v1205_v27  ;;  %1861 = vmatmul.msk.bf16.vlgmr.msrb.gmra.mxu1 %vm915_vm7, %v1274_v25  ;;  %v1250_v43 = vand.u32 2147483648, %v1205_v27  ;;  %v1248_v48 = vand.u32 2147483647, %v1205_v27  ;;  %vm1244_vm2 = vweird.f32 %v1205_v27 }
 0x47a   : > { %v1258_v29 = vadd.f32 %v2065_v18, %v1257_v26  ;;  %v1923_v26 = vld [vmem:[%s2405_s28 + $0x8] sm:$0xff] }
 0x47b   : > { %v1251_v54 = vor.u32 1.1754944e-38, %v1250_v43  ;;  %vm1249_vm4 = vcmp.eq.f32.partialorder %v1248_v48, 8.507059e+37 }
 0x47c   : > { %v1262_v32 = vsel %vm1261_vm14, %v2065_v18, %v1258_v29 }
 0x47d   : > { %v1267_v28 = vsel %vm1264_vm15, %v1266_v34, %v1262_v32 }
 0x47e   : > { %v1272_v33 = vmul.f32 %v2516_v62, %v1267_v28 }
 0x47f   : > { %v2067_v35 = vpop.eup %2066 }
 0x480   : > { %v1240_v36 = vmul.f32 %v2067_v35, %v1205_v27  ;;  %v1320_v37 = vpop.permute.xlu2 %1319  ;;  %vm1245_vm0 = vweird.f32 %v2067_v35  ;;  %v1276_v55 = vpack.c.bf16 %v1272_v33, %v1272_v33  ;;  %v1922_v27 = vld [vmem:[%s2405_s28] sm:$0xff] }
 0x481   : > { %v1325_v38 = vsel %vm922_vm6, %v1320_v37, 0  ;;  %vm1246_vm3 = vmor %vm1244_vm2, %vm1245_vm0  ;;  %v2046_v37 = vld [vmem:[%s2728_s24] ss:$0 sm:$0xff] }
 0x482   : > { %v1241_v39 = vsub.f32 1.0, %v1240_v36  ;;  %1334 = vmatpush.bf16.msra.mxu0 %v1325_v38  ;;  %v2047_v33 = vld [vmem:[%s778_s3] ss:$0 sm:$0xff]  ;;  %s2729_s3 = sld [smem:[#allocation26_spill]] (!%p1905_p4) }
 0x484   : > { %v1242_v44 = vmul.f32 %v2067_v35, %v1241_v39  ;;  %v1341_v49 = vpop.permute.xlu1 %1340 }
 0x485   : > { %v1346_v50 = vsel %vm922_vm6, %v1341_v49, 0  ;;  %v1931_v49 = vld [vmem:[%s2419_s20 + $0x38] sm:$0xff] }
 0x486   : > { %v1243_v53 = vadd.f32 %v2067_v35, %v1242_v44  ;;  %1355 = vmatpush.bf16.msrb.mxu2 %v1346_v50  ;;  %1557 = vmatpush.bf16.msra.mxu1 %v1931_v49  ;;  %v2048_v50 = vld [vmem:[%s786_s16] ss:$0 sm:$0xff] }
 0x488   : > { %v1247_v56 = vsel %vm1246_vm3, %v2067_v35, %v1243_v53  ;;  %v1930_v53 = vld [vmem:[%s2419_s20 + $0x30] sm:$0xff] }
 0x489   : > { %v1252_v58 = vsel %vm1249_vm4, %v1251_v54, %v1247_v56  ;;  %1863 = vmatmul.msk.bf16.vlgmr.msrb.gmra.mxu2 %vm915_vm7, %v1276_v55  ;;  %v1929_v56 = vld [vmem:[%s2419_s20 + $0x28] sm:$0xff] }
 0x48a   : > { %v1271_v59 = vmul.f32 %v2521_v0, %v1252_v58  ;;  %1558 = vmatpush.bf16.msra.mxu1 %v1930_v53 }
 0x48c   : > { %v1278_v61 = vpop.permute.xlu1 %1277  ;;  %v1275_v23 = vpack.c.bf16 %v1271_v59, %v1271_v59 }
 0x48d   : > { %v1283_v40 = vsel %vm922_vm6, %v1278_v61, 0  ;;  %vm1374_vm6 = vcmask 130048   ;;  %v1928_v61 = vld [vmem:[%s2419_s20 + $0x20] sm:$0xff] }
 0x48e   : > { %1292 = vmatpush.bf16.msrb.mxu3 %v1283_v40  ;;  %1862 = vmatmul.msk.bf16.vlgmr.msra.gmra.mxu0 %vm915_vm7, %v1275_v23 }
 0x48f   : > { %1559 = vmatpush.bf16.msra.mxu1 %v1929_v56 }
 0x492   : > { %1441 = vmatpush.bf16.msra.mxu3 %v1923_v26 }
 0x493   : > { %1560 = vmatpush.bf16.msra.mxu1 %v1928_v61 }
 0x496   : > { %1442 = vmatpush.bf16.msra.mxu3 %v1922_v27 }
 0x49f   : > { %v1199_v42 = vpop.xlane.xlu0 %1198 }
 0x4a0   : > { %2068 = vrcp.f32 %v1199_v42  ;;  %v1220_v51 = vand.u32 2147483648, %v1199_v42  ;;  %v1218_v63 = vand.u32 2147483647, %v1199_v42  ;;  %vm1214_vm8 = vweird.f32 %v1199_v42 }
 0x4a2   : > { %v1221_v0 = vor.u32 1.1754944e-38, %v1220_v51  ;;  %vm1219_vm10 = vcmp.eq.f32.partialorder %v1218_v63, 8.507059e+37 }
 0x4a6   : > { %v2069_v47 = vpop.eup %2068 }
 0x4a7   : > { %v1210_v45 = vmul.f32 %v2069_v47, %v1199_v42  ;;  %vm1215_vm5 = vweird.f32 %v2069_v47 }
 0x4a8   : > { %vm1216_vm9 = vmor %vm1214_vm8, %vm1215_vm5 }
 0x4a9   : > { %v1211_v62 = vsub.f32 1.0, %v1210_v45  ;;  %v1926_v45 = vld [vmem:[%s2419_s20 + $0x10] sm:$0xff] }
 0x4ab   : > { %v1212_v60 = vmul.f32 %v2069_v47, %v1211_v62 }
 0x4ad   : > { %v1213_v2 = vadd.f32 %v2069_v47, %v1212_v60  ;;  %v1925_v60 = vld [vmem:[%s2419_s20 + $0x8] sm:$0xff] }
 0x4af   : > { %v1217_v3 = vsel %vm1216_vm9, %v2069_v47, %v1213_v2  ;;  %v1927_v47 = vld [vmem:[%s2419_s20 + $0x18] sm:$0xff] }
 0x4b0   : > { %v1222_v4 = vsel %vm1219_vm10, %v1221_v0, %v1217_v3  ;;  %1561 = vmatpush.bf16.msra.mxu1 %v1927_v47 }
 0x4b1   : > { %v1269_v5 = vmul.f32 %v2528_v7, %v1222_v4  ;;  %v1924_v4 = vld [vmem:[%s2419_s20] sm:$0xff] }
 0x4b3   : > { %v1273_v6 = vpack.c.bf16 %v1269_v5, %v1269_v5 }
 0x4b4   : > { %1562 = vmatpush.bf16.msra.mxu1 %v1926_v45 }
 0x4b5   : > { %1860 = vmatmul.msk.bf16.vlgmr.msrb.gmra.mxu3 %vm915_vm7, %v1273_v6 }
 0x4b8   : > { %1563 = vmatpush.bf16.msra.mxu1 %v1925_v60 }
 0x4bc   : > { %1564 = vmatpush.bf16.msra.mxu1 %v1924_v4 }
 0x4f6   : > { %v1315_v46 = vpop.f32.mrf.mxu1 }
 0x4f7   : > { %1362 = vrot.lane.b32.xlu2 %v1315_v46, %s2185_s8  ;;  %s2730_s8 = sld [smem:[#allocation24_spill]] (!%p1905_p4) }
 0x4fe   : > { %v1317_v8 = vpop.f32.mrf.mxu1 }
 0x50b   : > { %v1336_v10 = vpop.f32.mrf.mxu0 }
 0x50c   : > { %v1357_v11 = vpop.f32.mrf.mxu2  ;;  %1366 = vrot.lane.b32.xlu1 %v1336_v10, %s2186_s25 }
 0x50d   : > { %1370 = vrot.lane.b32.xlu2 %v1357_v11, %s2187_s19 }
 0x513   : > { %v1338_v12 = vpop.f32.mrf.mxu0 }
 0x514   : > { %v1359_v52 = vpop.f32.mrf.mxu2 }
 0x538   : > { %v1294_v13 = vpop.f32.mrf.mxu3 }
 0x540   : > { %v1296_v14 = vpop.f32.mrf.mxu3 }
 0x551   : > { %v1363_v41 = vpop.permute.xlu2 %1362 }
 0x552   : > { %v1373_v7 = vsel %vm915_vm7, %v1294_v13, %v1363_v41 }
 0x567   : > { %v1371_v15 = vpop.permute.xlu2 %1370 }
 0x57e   : > { %v1367_v57 = vpop.permute.xlu1 %1366 }
 0x57f   : > { %v1375_v16 = vsel %vm1374_vm6, %v1373_v7, %v1367_v57 }
 0x580   : > { %v1377_v17 = vsel %vm1376_vm11, %v1375_v16, %v1371_v15 }
 0x581   : > { %v2545_v18 = vadd.f32 %v1377_v17, %v2431_v1 }
 0x583   : > { %v1381_v19 = vsel %vm811_vm1, %v2545_v18, 0.0 }
 0x584   : > { %1382 = vadd.xlane.f32.xlu1 %v1381_v19 }
 0x5f7   : > { %v1383_v20 = vpop.xlane.xlu1 %1382 }
 0x5f8   : > { %v1384_v21 = vmul.f32 %v1383_v20, %v2435_v9 }
 0x5fa   : > { %v1385_v22 = vsub.f32 %v2545_v18, %v1384_v21 }
 0x5fc   : > { %v1386_v24 = vmul.f32 %v1385_v22, %v1385_v22 }
 0x5fe   : > { %v1387_v25 = vsel %vm811_vm1, %v1386_v24, 0.0 }
 0x5ff   : > { %1388 = vadd.xlane.f32.xlu2 %v1387_v25 }
 0x672   : > { %v1389_v1 = vpop.xlane.xlu2 %1388 }
 0x673   : > { %v1390_v29 = vmul.f32 %v1389_v1, %v2435_v9 }
 0x675   : > { %v1391_v30 = vadd.f32 1e-06, %v1390_v29 }
 0x677   : > { %2070 = vrsqrt.f32 %v1391_v30  ;;  %vm1398_vm12 = vweird.f32 %v1391_v30 }
 0x67d   : > { %v2071_v31 = vpop.eup %2070 }
 0x67e   : > { %v1393_v32 = vmul.f32 %v2071_v31, %v1391_v30  ;;  %vm1399_vm7 = vweird.f32 %v2071_v31  ;;  %v2049_v30 = vld [vmem:[%s794_s21] ss:$0 sm:$0xff] }
 0x67f   : > { %vm1400_vm13 = vmor %vm1398_vm12, %vm1399_vm7 }
 0x680   : > { %v1394_v34 = vmul.f32 %v2071_v31, %v1393_v32 }
 0x682   : > { %v1395_v35 = vmul.f32 0.5, %v1394_v34 }
 0x684   : > { %v1396_v28 = vsub.f32 1.5, %v1395_v35 }
 0x686   : > { %v1397_v36 = vmul.f32 %v2071_v31, %v1396_v28 }
 0x688   : > { %v1401_v38 = vsel %vm1400_vm13, %v2071_v31, %v1397_v36 }
 0x689   : > { %v1402_v39 = vmul.f32 %v1401_v38, %v1385_v22  ;;  %v2188_v22 = vmov -1.0  }
 0x68b   : > { %v1406_v43 = vmul.f32 %v2046_v37, %v1402_v39 }
 0x68d   : > { %v1410_v44 = vadd.f32 %v2047_v33, %v1406_v43 }
 0x68f   : > { %v1411_v48 = vpack.c.bf16 %v1410_v44, %v1410_v44 }
 0x691   : > { %1872 = vmatmul.msk.bf16.vlgmr.msra.gmra.mxu3 %vm811_vm1, %v1411_v48 }
 0x714   : > { %v1444_v54 = vpop.f32.mrf.mxu3 }
 0x715   : > { %v1445_v55 = vadd.f32 %v2048_v50, %v1444_v54 }
 0x717   : > { %v1449_v58 = vmul.f32 0.70710677, %v1445_v55  ;;  %v1448_v26 = vmul.f32 0.5, %v1445_v55 }
 0x719   : > { %v1452_v59 = vand.u32 2147483647, %v1449_v58  ;;  %vm1450_vm3 = vcmp.ge.f32.partialorder %v1449_v58, 0.0 }
 0x71a   : > { %v1451_v24 = vsel %vm1450_vm3, 1.0, %v2188_v22 }
 0x71b   : > { %v1453_v23 = vmul.f32 0.3275911, %v1452_v59  ;;  %v1479_v10 = vsub.f32 0.0, %v1452_v59 }
 0x71c   : > { %v1446_v40 = vpop.f32.mrf.mxu3 }
 0x71d   : > { %v1454_v42 = vadd.f32 1.0, %v1453_v23  ;;  %v1480_v52 = vmul.f32 %v1479_v10, %v1452_v59 }
 0x71f   : > { %2072 = vrcp.f32 %v1454_v42  ;;  %v1466_v2 = vand.u32 2147483648, %v1454_v42  ;;  %v1464_v3 = vand.u32 2147483647, %v1454_v42  ;;  %vm1460_vm15 = vweird.f32 %v1454_v42 }
 0x720   : > { %v1481_v41 = vmul.f32 1.442695, %v1480_v52 }
 0x721   : > { %v1467_v6 = vor.u32 1.1754944e-38, %v1466_v2  ;;  %vm1465_vm2 = vcmp.eq.f32.partialorder %v1464_v3, 8.507059e+37 }
 0x722   : > { %2074 = vpow2.f32 %v1481_v41 }
 0x725   : > { %v2073_v62 = vpop.eup %2072 }
 0x726   : > { %v1456_v51 = vmul.f32 %v2073_v62, %v1454_v42  ;;  %vm1461_vm14 = vweird.f32 %v2073_v62 }
 0x727   : > { %vm1462_vm0 = vmor %vm1460_vm15, %vm1461_vm14 }
 0x728   : > { %v1457_v63 = vsub.f32 1.0, %v1456_v51  ;;  %v2075_v19 = vpop.eup %2074 }
 0x72a   : > { %v1458_v0 = vmul.f32 %v2073_v62, %v1457_v63 }
 0x72c   : > { %v1459_v5 = vadd.f32 %v2073_v62, %v1458_v0 }
 0x72e   : > { %v1463_v46 = vsel %vm1462_vm0, %v2073_v62, %v1459_v5 }
 0x72f   : > { %v1468_v8 = vsel %vm1465_vm2, %v1467_v6, %v1463_v46 }
 0x730   : > { %v1470_v11 = vmul.f32 1.0614054, %v1468_v8 }
 0x732   : > { %v1471_v12 = vadd.f32 -1.4531521, %v1470_v11 }
 0x734   : > { %v1472_v13 = vmul.f32 %v1471_v12, %v1468_v8 }
 0x736   : > { %v1473_v14 = vadd.f32 1.4214138, %v1472_v13 }
 0x738   : > { %v1474_v7 = vmul.f32 %v1473_v14, %v1468_v8 }
 0x73a   : > { %v1475_v57 = vadd.f32 -0.28449672, %v1474_v7 }
 0x73c   : > { %v1476_v15 = vmul.f32 %v1475_v57, %v1468_v8 }
 0x73e   : > { %v1477_v16 = vadd.f32 0.2548296, %v1476_v15 }
 0x740   : > { %v1478_v17 = vmul.f32 %v1477_v16, %v1468_v8 }
 0x742   : > { %v1483_v20 = vmul.f32 %v2075_v19, %v1478_v17 }
 0x744   : > { %v1484_v21 = vsub.f32 1.0, %v1483_v20 }
 0x746   : > { %v1485_v25 = vmul.f32 %v1484_v21, %v1451_v24 }
 0x748   : > { %v1486_v27 = vadd.f32 1.0, %v1485_v25 }
 0x74a   : > { %v1487_v1 = vmul.f32 %v1486_v27, %v1448_v26 }
 0x74c   : > { %v1488_v29 = vpack.c.bf16 %v1487_v1, %v1487_v1 }
 0x74e   : > { %1565 = vmatmul.bf16.vlgmr.msra.gmra.mxu1 %v1488_v29 }
 0x7cb   : > { %v1566_v31 = vpop.f32.mrf.mxu1 }
 0x7cc   : > { %v1567_v32 = vadd.f32 %v2049_v30, %v1566_v31 }
 0x7ce   : > { %v1570_v34 = vadd.f32 %v1567_v32, %v2545_v18 }
 0x7cf   : > { %1575 = sbr.rel (%p1905_p4) target bundleno = 2409 (0x969), region = 104 }
 0x7d0   : > { %1571 = vst.msk [vmem:[%s2428_s7] sm:$0xff] %vm811_vm1, %v1570_v34 }
 0x7d3   : > { %v1568_v35 = vpop.f32.mrf.mxu1 }
 0x7d4   : > { %vm1578_vm4 = vcmask 253952   ;;  %v1933_v18 = vld [vmem:[%s2729_s3 + $0x8] sm:$0xff]  ;;  %v1932_v43 = vld [vmem:[%s2729_s3] sm:$0xff]  ;;  %vm1637_vm10 = vcmask 81920  }
 0x7d5   : > { %v1579_v28 = vsel %vm1578_vm4, %v1570_v34, 0.0  ;;  %1630 = vmatpush.bf16.msra.mxu0 %v1933_v18  ;;  %v1576_v59 = vld [vmem:[%s2730_s8] sm:$0x1] }
 0x7d6   : > { %1580 = vadd.xlane.f32.xlu0 %v1579_v28  ;;  %v1608_v45 = vld [vmem:[%s2732_s15] sm:$0x1] }
 0x7d9   : > { %1631 = vmatpush.bf16.msra.mxu0 %v1932_v43 }
 0x849   : > { %v1581_v36 = vpop.xlane.xlu0 %1580 }
 0x84a   : > { %v1582_v37 = vmul.f32 %v1581_v36, %v2435_v9 }
 0x84c   : > { %v1583_v38 = vsub.f32 %v1570_v34, %v1582_v37 }
 0x84e   : > { %v1584_v39 = vmul.f32 %v1583_v38, %v1583_v38 }
 0x850   : > { %v1585_v33 = vsel %vm1578_vm4, %v1584_v39, 0.0 }
 0x851   : > { %1586 = vadd.xlane.f32.xlu0 %v1585_v33 }
 0x8c4   : > { %v1587_v44 = vpop.xlane.xlu0 %1586 }
 0x8c5   : > { %v1588_v48 = vmul.f32 %v1587_v44, %v2435_v9  ;;  %v1577_v9 = vld [vmem:[%s2731_s18] sm:$0x1] }
 0x8c7   : > { %v1589_v49 = vadd.f32 1e-06, %v1588_v48 }
 0x8c9   : > { %2076 = vrsqrt.f32 %v1589_v49  ;;  %vm1596_vm8 = vweird.f32 %v1589_v49 }
 0x8cf   : > { %v2077_v50 = vpop.eup %2076 }
 0x8d0   : > { %v1591_v53 = vmul.f32 %v2077_v50, %v1589_v49  ;;  %vm1597_vm5 = vweird.f32 %v2077_v50 }
 0x8d1   : > { %vm1598_vm9 = vmor %vm1596_vm8, %vm1597_vm5 }
 0x8d2   : > { %v1592_v54 = vmul.f32 %v2077_v50, %v1591_v53 }
 0x8d4   : > { %v1593_v55 = vmul.f32 0.5, %v1592_v54 }
 0x8d6   : > { %v1594_v56 = vsub.f32 1.5, %v1593_v55 }
 0x8d8   : > { %v1595_v58 = vmul.f32 %v2077_v50, %v1594_v56 }
 0x8da   : > { %v1599_v61 = vsel %vm1598_vm9, %v2077_v50, %v1595_v58 }
 0x8db   : > { %v1600_v23 = vmul.f32 %v1599_v61, %v1583_v38 }
 0x8dd   : > { %v1601_v40 = vmul.f32 %v1600_v23, %v1576_v59 }
 0x8df   : > { %v1602_v42 = vadd.f32 %v1601_v40, %v1577_v9 }
 0x8e1   : > { %v1603_v47 = vpack.c.bf16 %v1602_v42, %v1602_v42 }
 0x8e3   : > { %1914 = vmatmul.msk.bf16.vlgmr.msra.gmra.mxu0 %vm811_vm1, %v1603_v47 }
 0x960   : > { %v1633_v62 = vpop.f32.mrf.mxu0 }
 0x961   : > { %v1634_v51 = vadd.f32 %v1633_v62, %v1608_v45 }
 0x963   : > { %1638 = vst.msk [vmem:[%s2423_s26] sm:$0x1] %vm1637_vm10, %v1634_v51 }
 0x968   : > { %v1635_v60 = vpop.f32.mrf.mxu0 }
 0x969 PF: > { %s2733_s29 = sld [smem:[#allocation8_spill]]  ;;  %s1650_s22 = sshll.u32 %s2423_s26, 4  ;;  %s1651_s22 = int_to_ptr.vmem [resolvable:$true] %s1650_s22 }
 0x96a   : > { %s2734_s16 = sld [smem:[#allocation28_spill]]  ;;  %s2736_s0 = sand.u32 1, %s2148_s30  }
 0x96b   : > { %s1640_s1 = scalar_lea.sflag [#allocation4], %s2736_s0 }
 0x970   : > { %s1648_s21 = scalar_lea.hbm %s2734_s16, %s2733_s29  ;;  %s2098_s18 = scalar_lea.hbm %s2734_s16, 2 }
 0x971   : > { %s1652_s7 = sshll.u32 %s1648_s21, 4  ;;  %s1653_s7 = int_to_ptr.hbm [resolvable:$true] %s1652_s7 }
 0x972   : > { %s2092_s2 = sshra.s32 %s1653_s7, 4  ;;  %s2093_s2 = int_to_ptr.hbm [resolvable:$true] %s2092_s2 }
 0x973   : > { %s2094_s8 = scalar_lea.hbm %s2093_s2, 1  ;;  %p2099_p9 = scmp.lt.s32.totalorder %s2093_s2, %s2734_s16 }
 0x974   : > { %p2095_p5 = scmp.ne.s32.totalorder %s2093_s2, %s2094_s8  ;;  %p2100_p10 = scmp.lt.s32.totalorder %s2098_s18, %s2094_s8 }
 0x976   : > { %p2096_p6 = pnand %p2095_p5, %p2341_p3  ;;  %p2101_p11 = por %p2100_p10, %p2099_p9 }
 0x978   : > { %p2097_p7 = pneg %p2096_p6 }
 0x97a   : > { %p2102_p12 = pnand %p2101_p11, %p2097_p7 }
 0x97c   : > { %2105 = shalt.err (!%p2102_p12)
}
 0x97d   : > { %1935 = dma.vmem_to_hbm [thread:$0]  (%p2341_p3), %s1651_s22, 16, %s1653_s7, %s1640_s1  }
 0x97e PF: > { %s2737_s26 = sld [smem:[#allocation11_spill]] }
 0x97f   : > { %s2738_s15 = sld [smem:[#allocation6_spill]] }
 0x984   : > { %p1941_p13 = scmp.ge.s32.totalorder %s2737_s26, 2 }
 0x985   : > { %s1664_s17 = sand.u32 1, %s2738_s15  }
 0x986   : > { %p1938_p0 = pnand %p1941_p13, %p2352_p8  ;;  %s1665_s23 = scalar_lea.sflag [#allocation4], %s1664_s17 }
 0x988   : > { %p1939_p1 = pneg %p1938_p0 }
 0x98a   : > { %2139 = dma.done.wait (%p1939_p1), %s1665_s23, 16  }
 0x98b   : > { %2141 = vsyncadd (%p1939_p1), %s1665_s23, 4294967280  ;;  %s32_s23 = sadd.s32 1, %s2737_s26   ;;  %s2740_s21 = sld [smem:[#allocation7_spill]] }
 0x98c   : > { %p29_p2 = scmp.ge.s32.totalorder %s32_s23, 6   ;;  %s2741_s20 = sld [smem:[#allocation15_spill]] }
 0x98d   : > { %s2742_s2 = sld [smem:[#allocation9_spill]]  ;;  %s2746_s0 = smov %s2148_s30 }
 0x98e   : > { %s2743_s1 = sld [smem:[#allocation10_spill]] }
 0x98f   : > { %s2744_s22 = sld [smem:[#allocation12_spill]] }
 0x990   : > { %s2745_s7 = sld [smem:[#allocation14_spill]] }
 0x991   : > { %s2747_s30 = smov %s2740_s21 }
 0x992   :  { %31 = sbr.rel (!%p29_p2) target bundleno = 17 (0x11), region = 174 }
 0x993   : > { %s2748_s21 = smov %s2742_s2 }
 0x996   : > { %s2749_s2 = smov %s2745_s7 }
 0x997   :  { %1670 = vsyncpa [#allocation4], 1 }
 0x998   :  { %1672 = vsyncpa [#allocation4 + $0x1], 1 }

</bundles_post_ra>
